<compile_context>
chip_gen: v7x
topology: tpu7x:2x2x1
jax: 0.10.0
libtpu: 0.0.40
codegen_flags: <defaults>
</compile_context>

<pallas_src>
import functools
import math

import jax
import jax.numpy as jnp
from jax import lax
from jax.experimental import pallas as pl
from jax.experimental.pallas import tpu as pltpu

_INV_SQRT2 = 0.7071067811865476
_VMEM_LIMIT = 32 * 1024 * 1024      # explicit scoped-VMEM request (v5e default is only 16 MiB)
_MAX_LANE_TILE = 32 * 1024          # lane-tile cap for the streaming kernels


def _gelu_exact(y):
    # torch.nn.functional.gelu default (erf-based).
    return 0.5 * y * (1.0 + lax.erf(y * jnp.float32(_INV_SQRT2)))


def _lane_tiling(n, max_tile=_MAX_LANE_TILE):
    """Pick a lane tile: full extent if it fits, else the largest 128-multiple divisor
    of n (avoids the pad+slice HBM round trip); zero-padding only as a last resort."""
    if n <= max_tile:
        return n, n
    t = (max_tile // 128) * 128
    while t >= 128:
        if n % t == 0:
            return t, n
        t -= 128
    t = (max_tile // 128) * 128
    return t, pl.cdiv(n, t) * t      # pad fallback (correct; zero pad is stats-safe)


# --------------------------------------------------------------------------
# Kernel 1: spectral complex channel mixing on the 4 retained mode corners.
#   out[r,b,o,m] = sum_i x[r,b,i,m] * w[r,i,o,m]   (complex, per flattened mode m)
# grid=(4,): one step per corner, batch vectorized inside; re/im packed on sublanes.
# --------------------------------------------------------------------------
def _spectral_mul_kernel(x_ref, wr_ref, wi_ref, or_ref, oi_ref, *, cin):
    # x_ref : (B, 2*Cin, Mp)  rows [0:Cin]=re, [Cin:2Cin]=im (full 8 sublanes for Cin=4)
    # wr/wi : (Cin, Cout, Mp) resident per-corner weights
    # or/oi : (B, Cout, Mp)
    wr = wr_ref[...]
    wi = wi_ref[...]
    nb = x_ref.shape[0]
    for b in range(nb):                       # tiny static batch loop -> pure 2-D vector ops
        x = x_ref[b]                          # (2*Cin, Mp)
        acc_r = jnp.zeros(or_ref.shape[1:], jnp.float32)
        acc_i = jnp.zeros(oi_ref.shape[1:], jnp.float32)
        for i in range(cin):                  # static Cin -> unrolled VPU FMAs (no MXU)
            xr = x[i:i + 1, :]                # (1, Mp) sublane-broadcast row
            xi = x[cin + i:cin + i + 1, :]
            acc_r = acc_r + xr * wr[i] - xi * wi[i]
            acc_i = acc_i + xr * wi[i] + xi * wr[i]
        or_ref[b] = acc_r
        oi_ref[b] = acc_i


def spectral_mix_pallas(x_packed, wr, wi):
    """x_packed: (4, B, 2*Cin, Mp) f32.  wr/wi: (4, Cin, Cout, Mp) f32.
    Returns (out_re, out_im) each (4, B, Cout, Mp)."""
    R, B, two_cin, Mp = x_packed.shape
    cin = two_cin // 2
    cout = wr.shape[2]
    spec_x = pl.BlockSpec((None, B, two_cin, Mp), lambda r: (r, 0, 0, 0))
    spec_w = pl.BlockSpec((None, cin, cout, Mp), lambda r: (r, 0, 0, 0))
    spec_o = pl.BlockSpec((None, B, cout, Mp), lambda r: (r, 0, 0, 0))
    return pl.pallas_call(
        functools.partial(_spectral_mul_kernel, cin=cin),
        out_shape=(jax.ShapeDtypeStruct((R, B, cout, Mp), jnp.float32),
                   jax.ShapeDtypeStruct((R, B, cout, Mp), jnp.float32)),
        grid_spec=pltpu.PrefetchScalarGridSpec(
            num_scalar_prefetch=0,
            grid=(R,),                                    # 4 steps; v7x's 2 TCs split them
            in_specs=[spec_x, spec_w, spec_w],
            out_specs=[spec_o, spec_o],
        ),
        compiler_params=pltpu.CompilerParams(
            dimension_semantics=("parallel",),
            vmem_limit_bytes=_VMEM_LIMIT),
        cost_estimate=pl.CostEstimate(
            flops=8 * R * B * cin * cout * Mp,
            transcendentals=0,
            bytes_accessed=4 * (R * B * two_cin * Mp + 2 * R * cin * cout * Mp
                                + 2 * R * B * cout * Mp)),
    )(x_packed, wr, wi)


# --------------------------------------------------------------------------
# Kernel 2: real channel mixing (the 1x1x1 conv applied per retained spectrum bin).
#   out[b,o,n] = sum_i w[o,i] * x[b,i,n]     (no bias; see conv_b note above)
# --------------------------------------------------------------------------
def _channel_mix_kernel(x_ref, w_ref, o_ref):
    # x_ref: (Cin, TN)   w_ref: (Cout, Cin) resident   o_ref: (Cout, TN)
    x = x_ref[...]
    w = w_ref[...]
    cin = w.shape[1]
    acc = jnp.zeros(o_ref.shape, jnp.float32)
    for i in range(cin):                      # K=4 contraction -> unrolled VPU FMAs
        acc = acc + w[:, i:i + 1] * x[i:i + 1, :]
    o_ref[...] = acc.astype(o_ref.dtype)


def channel_mix_pallas(x_bcn, w):
    B, Cin, N = x_bcn.shape
    Cout = w.shape[0]
    tile_n, Np = _lane_tiling(N)
    if Np != N:
        x_bcn = jnp.pad(x_bcn, ((0, 0), (0, 0), (0, Np - N)))
    n_tiles = Np // tile_n
    out = pl.pallas_call(
        _channel_mix_kernel,
        out_shape=jax.ShapeDtypeStruct((B, Cout, Np), jnp.float32),
        grid_spec=pltpu.PrefetchScalarGridSpec(
            num_scalar_prefetch=0,
            grid=(B, n_tiles),
            in_specs=[
                pl.BlockSpec((None, Cin, tile_n), lambda b, j: (b, 0, j)),
                pl.BlockSpec((Cout, Cin), lambda b, j: (0, 0)),   # resident weights
            ],
            out_specs=pl.BlockSpec((None, Cout, tile_n), lambda b, j: (b, 0, j)),
        ),
        compiler_params=pltpu.CompilerParams(
            dimension_semantics=("parallel", "parallel"),
            vmem_limit_bytes=_VMEM_LIMIT),
        cost_estimate=pl.CostEstimate(
            flops=2 * B * Np * Cin * Cout,
            transcendentals=0,
            bytes_accessed=4 * (B * Np * (Cin + Cout) + Cout * Cin)),
    )(x_bcn, w)
    return out[:, :, :N] if Np != N else out


# --------------------------------------------------------------------------
# Kernel 3: InstanceNorm3d(affine=True) + exact GELU, two tiled passes.
#   pass 1: per-(b,c) sum / sum-of-squares accumulated over lane tiles
#   pass 2: normalize (biased var = E[s^2] - mean^2) + affine + GELU
# --------------------------------------------------------------------------
def _in_stats_kernel(s_ref, sum_ref, ssq_ref):
    # s_ref: (C, TN)    sum/ssq: (C, 1) accumulators, resident across the tile axis
    @pl.when(pl.program_id(1) == 0)
    def _():
        sum_ref[...] = jnp.zeros_like(sum_ref)
        ssq_ref[...] = jnp.zeros_like(ssq_ref)
    s = s_ref[...]
    sum_ref[...] += jnp.sum(s, axis=-1, keepdims=True)
    ssq_ref[...] += jnp.sum(s * s, axis=-1, keepdims=True)


def _in_norm_gelu_kernel(s_ref, sum_ref, ssq_ref, g_ref, b_ref, o_ref, *, inv_n, eps):
    # s/o: (C, TN)   sum/ssq/g/b: (C, 1)
    mean = sum_ref[...] * inv_n
    var = ssq_ref[...] * inv_n - mean * mean          # biased var, f32 accumulation
    scale = lax.rsqrt(var + eps) * g_ref[...]
    y = (s_ref[...] - mean) * scale + b_ref[...]
    o_ref[...] = _gelu_exact(y).astype(o_ref.dtype)


def instnorm_gelu_pallas(s, gamma, beta, *, eps=1e-5):
    """InstanceNorm3d(affine) + GELU on (B, C, N); stats over the flattened spatial N."""
    B, C, N = s.shape
    tile_n, Np = _lane_tiling(N)
    if Np != N:
        s = jnp.pad(s, ((0, 0), (0, 0), (0, Np - N)))  # zero pad adds 0 to sum & sumsq
    n_tiles = Np // tile_n
    g2 = gamma.reshape(C, 1)
    b2 = beta.reshape(C, 1)

    s_spec = pl.BlockSpec((None, C, tile_n), lambda b, j: (b, 0, j))
    stat_spec = pl.BlockSpec((None, C, 1), lambda b, j: (b, 0, 0))

    ssum, ssq = pl.pallas_call(
        _in_stats_kernel,
        out_shape=(jax.ShapeDtypeStruct((B, C, 1), jnp.float32),
                   jax.ShapeDtypeStruct((B, C, 1), jnp.float32)),
        grid_spec=pltpu.PrefetchScalarGridSpec(
            num_scalar_prefetch=0,
            grid=(B, n_tiles),
            in_specs=[s_spec],
            out_specs=[stat_spec, stat_spec],
        ),
        compiler_params=pltpu.CompilerParams(
            dimension_semantics=("parallel", "arbitrary"),    # tile axis is a reduction
            vmem_limit_bytes=_VMEM_LIMIT),
    )(s)

    out = pl.pallas_call(
        functools.partial(_in_norm_gelu_kernel, inv_n=1.0 / N, eps=eps),
        out_shape=jax.ShapeDtypeStruct((B, C, Np), s.dtype),
        grid_spec=pltpu.PrefetchScalarGridSpec(
            num_scalar_prefetch=0,
            grid=(B, n_tiles),
            in_specs=[s_spec, stat_spec, stat_spec,
                      pl.BlockSpec((C, 1), lambda b, j: (0, 0)),
                      pl.BlockSpec((C, 1), lambda b, j: (0, 0))],
            out_specs=s_spec,
        ),
        compiler_params=pltpu.CompilerParams(
            dimension_semantics=("parallel", "parallel"),
            vmem_limit_bytes=_VMEM_LIMIT),
        cost_estimate=pl.CostEstimate(
            flops=12 * B * C * Np,
            transcendentals=2 * B * C * Np,
            bytes_accessed=4 * 2 * B * C * Np),
    )(s, ssum, ssq, g2, b2)
    return out[:, :, :N] if Np != N else out


# --------------------------------------------------------------------------
# Full OperatorBlock_3D forward (Pallas kernels + jnp.fft for the 3D FFTs).
# --------------------------------------------------------------------------
def operator_block_3d_forward(x, params, *, dims, modes):
    dim1, dim2, dim3 = dims
    m1, m2, m3 = modes
    B, Cin = x.shape[0], x.shape[1]
    Cout = params["conv_w"].shape[0]
    # TODO(synk): assumes output grid == input grid (so the trilinear resize of
    # pointwise_op_3D is the identity) and non-overlapping corners
    # (2*m1 <= dim1, 2*m2 <= dim2, m3 <= dim3//2+1).

    # ---- one forward 3D rFFT shared by both branches ----
    # TODO(synk): 3D rFFT / irFFT have no Pallas equivalent; they stay in jnp.fft.
    x_ft = jnp.fft.rfftn(x, axes=(-3, -2, -1), norm="forward")

    # ---- spectral branch: complex channel mix on the 4 retained mode corners ----
    M = m1 * m2 * m3
    Mp = pl.cdiv(M, 128) * 128                       # lane-dense mode axis (144 -> 256)
    corners = jnp.stack([
        x_ft[:, :, :m1, :m2, :m3],
        x_ft[:, :, -m1:, :m2, :m3],
        x_ft[:, :, :m1, -m2:, :m3],
        x_ft[:, :, -m1:, -m2:, :m3],
    ], axis=0).reshape(4, B, Cin, M)
    x_packed = jnp.concatenate([jnp.real(corners), jnp.imag(corners)], axis=2)  # (4,B,2Cin,M)
    wr, wi = params["spec_wr"], params["spec_wi"]
    if Mp != M:
        x_packed = jnp.pad(x_packed, ((0, 0), (0, 0), (0, 0), (0, Mp - M)))
        wr = jnp.pad(wr, ((0, 0), (0, 0), (0, 0), (0, Mp - M)))
        wi = jnp.pad(wi, ((0, 0), (0, 0), (0, 0), (0, Mp - M)))
    spec_r, spec_i = spectral_mix_pallas(x_packed, wr, wi)
    spec_c = lax.complex(spec_r[..., :M], spec_i[..., :M]).reshape(4, B, Cout, m1, m2, m3)

    # ---- pointwise branch: conv1x1 commutes with the FFT -> apply W per low-pass bin
    #      of x_ft.  x2 = irfftn_forward(mask_lowpass(W @ x_ft)) + conv_b; conv_b cancels
    #      exactly under InstanceNorm's per-(b,c) mean removal and is omitted. ----
    h1, h2, h3 = dim1 // 2, dim2 // 2, dim3 // 2
    n_pw = 4 * h1 * h2 * h3
    pw = jnp.stack([
        x_ft[:, :, :h1, :h2, :h3],
        x_ft[:, :, -h1:, :h2, :h3],
        x_ft[:, :, :h1, -h2:, :h3],
        x_ft[:, :, -h1:, -h2:, :h3],
    ], axis=2).reshape(B, Cin, n_pw)
    pw_ri = jnp.concatenate([jnp.real(pw), jnp.imag(pw)], axis=-1)   # (B, Cin, 2*n_pw)
    y_pw = channel_mix_pallas(pw_ri, params["conv_w"])               # (B, Cout, 2*n_pw)
    pw_c = lax.complex(y_pw[..., :n_pw], y_pw[..., n_pw:]).reshape(B, Cout, 4, h1, h2, h3)

    # ---- merge both branches in spectrum space -> single inverse FFT ----
    kz = dim3 // 2 + 1
    out_ft = jnp.zeros((B, Cout, dim1, dim2, kz), jnp.complex64)
    out_ft = out_ft.at[:, :, :m1, :m2, :m3].add(spec_c[0])
    out_ft = out_ft.at[:, :, -m1:, :m2, :m3].add(spec_c[1])
    out_ft = out_ft.at[:, :, :m1, -m2:, :m3].add(spec_c[2])
    out_ft = out_ft.at[:, :, -m1:, -m2:, :m3].add(spec_c[3])
    out_ft = out_ft.at[:, :, :h1, :h2, :h3].add(pw_c[:, :, 0])
    out_ft = out_ft.at[:, :, -h1:, :h2, :h3].add(pw_c[:, :, 1])
    out_ft = out_ft.at[:, :, :h1, -h2:, :h3].add(pw_c[:, :, 2])
    out_ft = out_ft.at[:, :, -h1:, -h2:, :h3].add(pw_c[:, :, 3])
    s = jnp.fft.irfftn(out_ft, s=(dim1, dim2, dim3), axes=(-3, -2, -1), norm="forward")

    # ---- InstanceNorm3d(affine) + exact GELU (tiled two-pass Pallas kernels) ----
    n_sp = dim1 * dim2 * dim3
    y = instnorm_gelu_pallas(s.reshape(B, Cout, n_sp),
                             params["in_gamma"], params["in_beta"])
    return y.reshape(B, Cout, dim1, dim2, dim3)


# --------------------------------------------------------------------------
# Pure-JAX reference of the original PyTorch forward (op-by-op, for verification).
# --------------------------------------------------------------------------
def operator_block_3d_reference(x, params, *, dims, modes):
    dim1, dim2, dim3 = dims
    m1, m2, m3 = modes
    B, Cin = x.shape[0], x.shape[1]
    Cout = params["conv_w"].shape[0]
    wc = lax.complex(params["spec_wr"], params["spec_wi"]).reshape(4, Cin, Cout, m1, m2, m3)

    x_ft = jnp.fft.rfftn(x, axes=(-3, -2, -1), norm="forward")
    cmul = lambda a, w: jnp.einsum("bixyz,ioxyz->boxyz", a, w)
    kz = dim3 // 2 + 1
    out_ft = jnp.zeros((B, Cout, dim1, dim2, kz), jnp.complex64)
    out_ft = out_ft.at[:, :, :m1, :m2, :m3].set(cmul(x_ft[:, :, :m1, :m2, :m3], wc[0]))
    out_ft = out_ft.at[:, :, -m1:, :m2, :m3].set(cmul(x_ft[:, :, -m1:, :m2, :m3], wc[1]))
    out_ft = out_ft.at[:, :, :m1, -m2:, :m3].set(cmul(x_ft[:, :, :m1, -m2:, :m3], wc[2]))
    out_ft = out_ft.at[:, :, -m1:, -m2:, :m3].set(cmul(x_ft[:, :, -m1:, -m2:, :m3], wc[3]))
    x1 = jnp.fft.irfftn(out_ft, s=(dim1, dim2, dim3), axes=(-3, -2, -1), norm="forward")

    x2 = jnp.einsum("oi,bixyz->boxyz", params["conv_w"], x) \
        + params["conv_b"][None, :, None, None, None]
    ft = jnp.fft.rfftn(x2, axes=(-3, -2, -1))
    h1, h2, h3 = dim1 // 2, dim2 // 2, dim3 // 2
    ft_u = jnp.zeros_like(ft)
    ft_u = ft_u.at[:, :, :h1, :h2, :h3].set(ft[:, :, :h1, :h2, :h3])
    ft_u = ft_u.at[:, :, -h1:, :h2, :h3].set(ft[:, :, -h1:, :h2, :h3])
    ft_u = ft_u.at[:, :, :h1, -h2:, :h3].set(ft[:, :, :h1, -h2:, :h3])
    ft_u = ft_u.at[:, :, -h1:, -h2:, :h3].set(ft[:, :, -h1:, -h2:, :h3])
    x2 = jnp.fft.irfftn(ft_u, s=(dim1, dim2, dim3), axes=(-3, -2, -1))

    s = x1 + x2
    mean = jnp.mean(s, axis=(-3, -2, -1), keepdims=True)
    var = jnp.mean((s - mean) ** 2, axis=(-3, -2, -1), keepdims=True)
    y = (s - mean) / jnp.sqrt(var + 1e-5)
    y = y * params["in_gamma"][None, :, None, None, None] \
        + params["in_beta"][None, :, None, None, None]
    return _gelu_exact(y)


def init_params(key, in_codim, out_codim, m1, m2, m3):
    ks = jax.random.split(key, 4)
    scale = (1.0 / (2.0 * in_codim)) ** 0.5
    M = m1 * m2 * m3
    # Spectral weights (weights1..4) stored as split re/im, modes flattened.
    spec_wr = scale * jax.random.normal(ks[0], (4, in_codim, out_codim, M), jnp.float32)
    spec_wi = scale * jax.random.normal(ks[1], (4, in_codim, out_codim, M), jnp.float32)
    kb = 1.0 / math.sqrt(in_codim)   # nn.Conv3d(kernel_size=1) default init bound
    conv_w = jax.random.uniform(ks[2], (out_codim, in_codim), jnp.float32, -kb, kb)
    conv_b = jax.random.uniform(ks[3], (out_codim,), jnp.float32, -kb, kb)
    return dict(
        spec_wr=spec_wr, spec_wi=spec_wi,
        conv_w=conv_w, conv_b=conv_b,
        in_gamma=jnp.ones((out_codim,), jnp.float32),   # InstanceNorm3d affine init
        in_beta=jnp.zeros((out_codim,), jnp.float32),
    )


if __name__ == "__main__":
    # Small shapes consistent with the module: batch=2, in_codim=4, out_codim=8,
    # grid 16x16x8, modes (6, 6, 4).
    B, in_codim, out_codim = 2, 4, 8
    dim1, dim2, dim3 = 16, 16, 8
    m1, m2, m3 = 6, 6, 4

    key = jax.random.PRNGKey(0)
    kx, kp = jax.random.split(key)
    x = jax.random.normal(kx, (B, in_codim, dim1, dim2, dim3), jnp.float32)
    params = init_params(kp, in_codim, out_codim, m1, m2, m3)

    fwd = jax.jit(functools.partial(operator_block_3d_forward,
                                    dims=(dim1, dim2, dim3), modes=(m1, m2, m3)))
    out = jax.block_until_ready(fwd(x, params))

    ref = operator_block_3d_reference(x, params, dims=(dim1, dim2, dim3),
                                      modes=(m1, m2, m3))
    assert out.shape == (B, out_codim, dim1, dim2, dim3)
    err = float(jnp.max(jnp.abs(out - ref)))
    assert err < 5e-4, f"mismatch vs reference: {err}"

    print("KERNEL_OK")
</pallas_src>

<mosaic_0001>
module attributes {stable_mosaic.version = 11 : i64} {
  func.func @_spectral_mul_kernel(%arg0: i32, %arg1: memref<1x2x8x256xf32, #tpu.memory_space<vmem>>, %arg2: memref<1x4x8x256xf32, #tpu.memory_space<vmem>>, %arg3: memref<1x4x8x256xf32, #tpu.memory_space<vmem>>, %arg4: memref<1x2x8x256xf32, #tpu.memory_space<vmem>>, %arg5: memref<1x2x8x256xf32, #tpu.memory_space<vmem>>) attributes {dimension_semantics = [#tpu.dimension_semantics<parallel>], iteration_bounds = array<i64: 4>, scalar_prefetch = 0 : i64, scratch_operands = 0 : i64, tpu.core_type = #tpu.core_type<tc>, window_params = [{transform_indices = @transform_0, window_bounds = array<i64: 1, 2, 8, 256>}, {transform_indices = @transform_1, window_bounds = array<i64: 1, 4, 8, 256>}, {transform_indices = @transform_2, window_bounds = array<i64: 1, 4, 8, 256>}, {transform_indices = @transform_3, window_bounds = array<i64: 1, 2, 8, 256>}, {transform_indices = @transform_4, window_bounds = array<i64: 1, 2, 8, 256>}]} {
    %c0 = arith.constant 0 : index
    %c0_0 = arith.constant 0 : index
    %c0_1 = arith.constant 0 : index
    %c0_2 = arith.constant 0 : index
    %0 = vector.load %arg2[%c0, %c0_0, %c0_1, %c0_2] : memref<1x4x8x256xf32, #tpu.memory_space<vmem>>, vector<1x4x8x256xf32>
    %1 = vector.shape_cast %0 : vector<1x4x8x256xf32> to vector<4x8x256xf32>
    %c0_3 = arith.constant 0 : index
    %c0_4 = arith.constant 0 : index
    %c0_5 = arith.constant 0 : index
    %c0_6 = arith.constant 0 : index
    %2 = vector.load %arg3[%c0_3, %c0_4, %c0_5, %c0_6] : memref<1x4x8x256xf32, #tpu.memory_space<vmem>>, vector<1x4x8x256xf32>
    %3 = vector.shape_cast %2 : vector<1x4x8x256xf32> to vector<4x8x256xf32>
    %c0_7 = arith.constant 0 : index
    %c0_8 = arith.constant 0 : index
    %c0_9 = arith.constant 0 : index
    %c0_10 = arith.constant 0 : index
    %4 = vector.load %arg1[%c0_7, %c0_8, %c0_9, %c0_10] : memref<1x2x8x256xf32, #tpu.memory_space<vmem>>, vector<1x1x8x256xf32>
    %5 = vector.shape_cast %4 : vector<1x1x8x256xf32> to vector<8x256xf32>
    %cst = arith.constant 0.000000e+00 : f32
    %6 = vector.broadcast %cst : f32 to vector<8x256xf32>
    %cst_11 = arith.constant 0.000000e+00 : f32
    %7 = vector.broadcast %cst_11 : f32 to vector<8x256xf32>
    %8 = vector.extract_strided_slice %5 {offsets = [0, 0], sizes = [1, 256], strides = [1, 1]} : vector<8x256xf32> to vector<1x256xf32>
    %9 = vector.extract_strided_slice %5 {offsets = [4, 0], sizes = [1, 256], strides = [1, 1]} : vector<8x256xf32> to vector<1x256xf32>
    %10 = vector.extract_strided_slice %1 {offsets = [0, 0, 0], sizes = [1, 8, 256], strides = [1, 1, 1]} : vector<4x8x256xf32> to vector<1x8x256xf32>
    %11 = vector.shape_cast %10 : vector<1x8x256xf32> to vector<8x256xf32>
    %12 = vector.broadcast %8 : vector<1x256xf32> to vector<8x256xf32>
    %13 = arith.mulf %12, %11 : vector<8x256xf32>
    %14 = arith.addf %6, %13 : vector<8x256xf32>
    %15 = vector.extract_strided_slice %3 {offsets = [0, 0, 0], sizes = [1, 8, 256], strides = [1, 1, 1]} : vector<4x8x256xf32> to vector<1x8x256xf32>
    %16 = vector.shape_cast %15 : vector<1x8x256xf32> to vector<8x256xf32>
    %17 = vector.broadcast %9 : vector<1x256xf32> to vector<8x256xf32>
    %18 = arith.mulf %17, %16 : vector<8x256xf32>
    %19 = arith.subf %14, %18 : vector<8x256xf32>
    %20 = vector.extract_strided_slice %3 {offsets = [0, 0, 0], sizes = [1, 8, 256], strides = [1, 1, 1]} : vector<4x8x256xf32> to vector<1x8x256xf32>
    %21 = vector.shape_cast %20 : vector<1x8x256xf32> to vector<8x256xf32>
    %22 = vector.broadcast %8 : vector<1x256xf32> to vector<8x256xf32>
    %23 = arith.mulf %22, %21 : vector<8x256xf32>
    %24 = arith.addf %7, %23 : vector<8x256xf32>
    %25 = vector.extract_strided_slice %1 {offsets = [0, 0, 0], sizes = [1, 8, 256], strides = [1, 1, 1]} : vector<4x8x256xf32> to vector<1x8x256xf32>
    %26 = vector.shape_cast %25 : vector<1x8x256xf32> to vector<8x256xf32>
    %27 = vector.broadcast %9 : vector<1x256xf32> to vector<8x256xf32>
    %28 = arith.mulf %27, %26 : vector<8x256xf32>
    %29 = arith.addf %24, %28 : vector<8x256xf32>
    %30 = vector.extract_strided_slice %5 {offsets = [1, 0], sizes = [1, 256], strides = [1, 1]} : vector<8x256xf32> to vector<1x256xf32>
    %31 = vector.extract_strided_slice %5 {offsets = [5, 0], sizes = [1, 256], strides = [1, 1]} : vector<8x256xf32> to vector<1x256xf32>
    %32 = vector.extract_strided_slice %1 {offsets = [1, 0, 0], sizes = [1, 8, 256], strides = [1, 1, 1]} : vector<4x8x256xf32> to vector<1x8x256xf32>
    %33 = vector.shape_cast %32 : vector<1x8x256xf32> to vector<8x256xf32>
    %34 = vector.broadcast %30 : vector<1x256xf32> to vector<8x256xf32>
    %35 = arith.mulf %34, %33 : vector<8x256xf32>
    %36 = arith.addf %19, %35 : vector<8x256xf32>
    %37 = vector.extract_strided_slice %3 {offsets = [1, 0, 0], sizes = [1, 8, 256], strides = [1, 1, 1]} : vector<4x8x256xf32> to vector<1x8x256xf32>
    %38 = vector.shape_cast %37 : vector<1x8x256xf32> to vector<8x256xf32>
    %39 = vector.broadcast %31 : vector<1x256xf32> to vector<8x256xf32>
    %40 = arith.mulf %39, %38 : vector<8x256xf32>
    %41 = arith.subf %36, %40 : vector<8x256xf32>
    %42 = vector.extract_strided_slice %3 {offsets = [1, 0, 0], sizes = [1, 8, 256], strides = [1, 1, 1]} : vector<4x8x256xf32> to vector<1x8x256xf32>
    %43 = vector.shape_cast %42 : vector<1x8x256xf32> to vector<8x256xf32>
    %44 = vector.broadcast %30 : vector<1x256xf32> to vector<8x256xf32>
    %45 = arith.mulf %44, %43 : vector<8x256xf32>
    %46 = arith.addf %29, %45 : vector<8x256xf32>
    %47 = vector.extract_strided_slice %1 {offsets = [1, 0, 0], sizes = [1, 8, 256], strides = [1, 1, 1]} : vector<4x8x256xf32> to vector<1x8x256xf32>
    %48 = vector.shape_cast %47 : vector<1x8x256xf32> to vector<8x256xf32>
    %49 = vector.broadcast %31 : vector<1x256xf32> to vector<8x256xf32>
    %50 = arith.mulf %49, %48 : vector<8x256xf32>
    %51 = arith.addf %46, %50 : vector<8x256xf32>
    %52 = vector.extract_strided_slice %5 {offsets = [2, 0], sizes = [1, 256], strides = [1, 1]} : vector<8x256xf32> to vector<1x256xf32>
    %53 = vector.extract_strided_slice %5 {offsets = [6, 0], sizes = [1, 256], strides = [1, 1]} : vector<8x256xf32> to vector<1x256xf32>
    %54 = vector.extract_strided_slice %1 {offsets = [2, 0, 0], sizes = [1, 8, 256], strides = [1, 1, 1]} : vector<4x8x256xf32> to vector<1x8x256xf32>
    %55 = vector.shape_cast %54 : vector<1x8x256xf32> to vector<8x256xf32>
    %56 = vector.broadcast %52 : vector<1x256xf32> to vector<8x256xf32>
    %57 = arith.mulf %56, %55 : vector<8x256xf32>
    %58 = arith.addf %41, %57 : vector<8x256xf32>
    %59 = vector.extract_strided_slice %3 {offsets = [2, 0, 0], sizes = [1, 8, 256], strides = [1, 1, 1]} : vector<4x8x256xf32> to vector<1x8x256xf32>
    %60 = vector.shape_cast %59 : vector<1x8x256xf32> to vector<8x256xf32>
    %61 = vector.broadcast %53 : vector<1x256xf32> to vector<8x256xf32>
    %62 = arith.mulf %61, %60 : vector<8x256xf32>
    %63 = arith.subf %58, %62 : vector<8x256xf32>
    %64 = vector.extract_strided_slice %3 {offsets = [2, 0, 0], sizes = [1, 8, 256], strides = [1, 1, 1]} : vector<4x8x256xf32> to vector<1x8x256xf32>
    %65 = vector.shape_cast %64 : vector<1x8x256xf32> to vector<8x256xf32>
    %66 = vector.broadcast %52 : vector<1x256xf32> to vector<8x256xf32>
    %67 = arith.mulf %66, %65 : vector<8x256xf32>
    %68 = arith.addf %51, %67 : vector<8x256xf32>
    %69 = vector.extract_strided_slice %1 {offsets = [2, 0, 0], sizes = [1, 8, 256], strides = [1, 1, 1]} : vector<4x8x256xf32> to vector<1x8x256xf32>
    %70 = vector.shape_cast %69 : vector<1x8x256xf32> to vector<8x256xf32>
    %71 = vector.broadcast %53 : vector<1x256xf32> to vector<8x256xf32>
    %72 = arith.mulf %71, %70 : vector<8x256xf32>
    %73 = arith.addf %68, %72 : vector<8x256xf32>
    %74 = vector.extract_strided_slice %5 {offsets = [3, 0], sizes = [1, 256], strides = [1, 1]} : vector<8x256xf32> to vector<1x256xf32>
    %75 = vector.extract_strided_slice %5 {offsets = [7, 0], sizes = [1, 256], strides = [1, 1]} : vector<8x256xf32> to vector<1x256xf32>
    %76 = vector.extract_strided_slice %1 {offsets = [3, 0, 0], sizes = [1, 8, 256], strides = [1, 1, 1]} : vector<4x8x256xf32> to vector<1x8x256xf32>
    %77 = vector.shape_cast %76 : vector<1x8x256xf32> to vector<8x256xf32>
    %78 = vector.broadcast %74 : vector<1x256xf32> to vector<8x256xf32>
    %79 = arith.mulf %78, %77 : vector<8x256xf32>
    %80 = arith.addf %63, %79 : vector<8x256xf32>
    %81 = vector.extract_strided_slice %3 {offsets = [3, 0, 0], sizes = [1, 8, 256], strides = [1, 1, 1]} : vector<4x8x256xf32> to vector<1x8x256xf32>
    %82 = vector.shape_cast %81 : vector<1x8x256xf32> to vector<8x256xf32>
    %83 = vector.broadcast %75 : vector<1x256xf32> to vector<8x256xf32>
    %84 = arith.mulf %83, %82 : vector<8x256xf32>
    %85 = arith.subf %80, %84 : vector<8x256xf32>
    %86 = vector.extract_strided_slice %3 {offsets = [3, 0, 0], sizes = [1, 8, 256], strides = [1, 1, 1]} : vector<4x8x256xf32> to vector<1x8x256xf32>
    %87 = vector.shape_cast %86 : vector<1x8x256xf32> to vector<8x256xf32>
    %88 = vector.broadcast %74 : vector<1x256xf32> to vector<8x256xf32>
    %89 = arith.mulf %88, %87 : vector<8x256xf32>
    %90 = arith.addf %73, %89 : vector<8x256xf32>
    %91 = vector.extract_strided_slice %1 {offsets = [3, 0, 0], sizes = [1, 8, 256], strides = [1, 1, 1]} : vector<4x8x256xf32> to vector<1x8x256xf32>
    %92 = vector.shape_cast %91 : vector<1x8x256xf32> to vector<8x256xf32>
    %93 = vector.broadcast %75 : vector<1x256xf32> to vector<8x256xf32>
    %94 = arith.mulf %93, %92 : vector<8x256xf32>
    %95 = arith.addf %90, %94 : vector<8x256xf32>
    %c0_12 = arith.constant 0 : index
    %c0_13 = arith.constant 0 : index
    %c0_14 = arith.constant 0 : index
    %c0_15 = arith.constant 0 : index
    %96 = vector.load %arg4[%c0_12, %c0_13, %c0_14, %c0_15] : memref<1x2x8x256xf32, #tpu.memory_space<vmem>>, vector<1x1x8x256xf32>
    %97 = vector.shape_cast %96 : vector<1x1x8x256xf32> to vector<8x256xf32>
    %98 = vector.shape_cast %85 : vector<8x256xf32> to vector<1x1x8x256xf32>
    tpu.vector_store %arg4[%c0_12, %c0_13, %c0_14, %c0_15], %98 {strides = array<i32>} : memref<1x2x8x256xf32, #tpu.memory_space<vmem>>, vector<1x1x8x256xf32>,
    %c0_16 = arith.constant 0 : index
    %c0_17 = arith.constant 0 : index
    %c0_18 = arith.constant 0 : index
    %c0_19 = arith.constant 0 : index
    %99 = vector.load %arg5[%c0_16, %c0_17, %c0_18, %c0_19] : memref<1x2x8x256xf32, #tpu.memory_space<vmem>>, vector<1x1x8x256xf32>
    %100 = vector.shape_cast %99 : vector<1x1x8x256xf32> to vector<8x256xf32>
    %101 = vector.shape_cast %95 : vector<8x256xf32> to vector<1x1x8x256xf32>
    tpu.vector_store %arg5[%c0_16, %c0_17, %c0_18, %c0_19], %101 {strides = array<i32>} : memref<1x2x8x256xf32, #tpu.memory_space<vmem>>, vector<1x1x8x256xf32>,
    %c0_20 = arith.constant 0 : index
    %c1 = arith.constant 1 : index
    %c0_21 = arith.constant 0 : index
    %c0_22 = arith.constant 0 : index
    %102 = vector.load %arg1[%c0_20, %c1, %c0_21, %c0_22] : memref<1x2x8x256xf32, #tpu.memory_space<vmem>>, vector<1x1x8x256xf32>
    %103 = vector.shape_cast %102 : vector<1x1x8x256xf32> to vector<8x256xf32>
    %cst_23 = arith.constant 0.000000e+00 : f32
    %104 = vector.broadcast %cst_23 : f32 to vector<8x256xf32>
    %cst_24 = arith.constant 0.000000e+00 : f32
    %105 = vector.broadcast %cst_24 : f32 to vector<8x256xf32>
    %106 = vector.extract_strided_slice %103 {offsets = [0, 0], sizes = [1, 256], strides = [1, 1]} : vector<8x256xf32> to vector<1x256xf32>
    %107 = vector.extract_strided_slice %103 {offsets = [4, 0], sizes = [1, 256], strides = [1, 1]} : vector<8x256xf32> to vector<1x256xf32>
    %108 = vector.extract_strided_slice %1 {offsets = [0, 0, 0], sizes = [1, 8, 256], strides = [1, 1, 1]} : vector<4x8x256xf32> to vector<1x8x256xf32>
    %109 = vector.shape_cast %108 : vector<1x8x256xf32> to vector<8x256xf32>
    %110 = vector.broadcast %106 : vector<1x256xf32> to vector<8x256xf32>
    %111 = arith.mulf %110, %109 : vector<8x256xf32>
    %112 = arith.addf %104, %111 : vector<8x256xf32>
    %113 = vector.extract_strided_slice %3 {offsets = [0, 0, 0], sizes = [1, 8, 256], strides = [1, 1, 1]} : vector<4x8x256xf32> to vector<1x8x256xf32>
    %114 = vector.shape_cast %113 : vector<1x8x256xf32> to vector<8x256xf32>
    %115 = vector.broadcast %107 : vector<1x256xf32> to vector<8x256xf32>
    %116 = arith.mulf %115, %114 : vector<8x256xf32>
    %117 = arith.subf %112, %116 : vector<8x256xf32>
    %118 = vector.extract_strided_slice %3 {offsets = [0, 0, 0], sizes = [1, 8, 256], strides = [1, 1, 1]} : vector<4x8x256xf32> to vector<1x8x256xf32>
    %119 = vector.shape_cast %118 : vector<1x8x256xf32> to vector<8x256xf32>
    %120 = vector.broadcast %106 : vector<1x256xf32> to vector<8x256xf32>
    %121 = arith.mulf %120, %119 : vector<8x256xf32>
    %122 = arith.addf %105, %121 : vector<8x256xf32>
    %123 = vector.extract_strided_slice %1 {offsets = [0, 0, 0], sizes = [1, 8, 256], strides = [1, 1, 1]} : vector<4x8x256xf32> to vector<1x8x256xf32>
    %124 = vector.shape_cast %123 : vector<1x8x256xf32> to vector<8x256xf32>
    %125 = vector.broadcast %107 : vector<1x256xf32> to vector<8x256xf32>
    %126 = arith.mulf %125, %124 : vector<8x256xf32>
    %127 = arith.addf %122, %126 : vector<8x256xf32>
    %128 = vector.extract_strided_slice %103 {offsets = [1, 0], sizes = [1, 256], strides = [1, 1]} : vector<8x256xf32> to vector<1x256xf32>
    %129 = vector.extract_strided_slice %103 {offsets = [5, 0], sizes = [1, 256], strides = [1, 1]} : vector<8x256xf32> to vector<1x256xf32>
    %130 = vector.extract_strided_slice %1 {offsets = [1, 0, 0], sizes = [1, 8, 256], strides = [1, 1, 1]} : vector<4x8x256xf32> to vector<1x8x256xf32>
    %131 = vector.shape_cast %130 : vector<1x8x256xf32> to vector<8x256xf32>
    %132 = vector.broadcast %128 : vector<1x256xf32> to vector<8x256xf32>
    %133 = arith.mulf %132, %131 : vector<8x256xf32>
    %134 = arith.addf %117, %133 : vector<8x256xf32>
    %135 = vector.extract_strided_slice %3 {offsets = [1, 0, 0], sizes = [1, 8, 256], strides = [1, 1, 1]} : vector<4x8x256xf32> to vector<1x8x256xf32>
    %136 = vector.shape_cast %135 : vector<1x8x256xf32> to vector<8x256xf32>
    %137 = vector.broadcast %129 : vector<1x256xf32> to vector<8x256xf32>
    %138 = arith.mulf %137, %136 : vector<8x256xf32>
    %139 = arith.subf %134, %138 : vector<8x256xf32>
    %140 = vector.extract_strided_slice %3 {offsets = [1, 0, 0], sizes = [1, 8, 256], strides = [1, 1, 1]} : vector<4x8x256xf32> to vector<1x8x256xf32>
    %141 = vector.shape_cast %140 : vector<1x8x256xf32> to vector<8x256xf32>
    %142 = vector.broadcast %128 : vector<1x256xf32> to vector<8x256xf32>
    %143 = arith.mulf %142, %141 : vector<8x256xf32>
    %144 = arith.addf %127, %143 : vector<8x256xf32>
    %145 = vector.extract_strided_slice %1 {offsets = [1, 0, 0], sizes = [1, 8, 256], strides = [1, 1, 1]} : vector<4x8x256xf32> to vector<1x8x256xf32>
    %146 = vector.shape_cast %145 : vector<1x8x256xf32> to vector<8x256xf32>
    %147 = vector.broadcast %129 : vector<1x256xf32> to vector<8x256xf32>
    %148 = arith.mulf %147, %146 : vector<8x256xf32>
    %149 = arith.addf %144, %148 : vector<8x256xf32>
    %150 = vector.extract_strided_slice %103 {offsets = [2, 0], sizes = [1, 256], strides = [1, 1]} : vector<8x256xf32> to vector<1x256xf32>
    %151 = vector.extract_strided_slice %103 {offsets = [6, 0], sizes = [1, 256], strides = [1, 1]} : vector<8x256xf32> to vector<1x256xf32>
    %152 = vector.extract_strided_slice %1 {offsets = [2, 0, 0], sizes = [1, 8, 256], strides = [1, 1, 1]} : vector<4x8x256xf32> to vector<1x8x256xf32>
    %153 = vector.shape_cast %152 : vector<1x8x256xf32> to vector<8x256xf32>
    %154 = vector.broadcast %150 : vector<1x256xf32> to vector<8x256xf32>
    %155 = arith.mulf %154, %153 : vector<8x256xf32>
    %156 = arith.addf %139, %155 : vector<8x256xf32>
    %157 = vector.extract_strided_slice %3 {offsets = [2, 0, 0], sizes = [1, 8, 256], strides = [1, 1, 1]} : vector<4x8x256xf32> to vector<1x8x256xf32>
    %158 = vector.shape_cast %157 : vector<1x8x256xf32> to vector<8x256xf32>
    %159 = vector.broadcast %151 : vector<1x256xf32> to vector<8x256xf32>
    %160 = arith.mulf %159, %158 : vector<8x256xf32>
    %161 = arith.subf %156, %160 : vector<8x256xf32>
    %162 = vector.extract_strided_slice %3 {offsets = [2, 0, 0], sizes = [1, 8, 256], strides = [1, 1, 1]} : vector<4x8x256xf32> to vector<1x8x256xf32>
    %163 = vector.shape_cast %162 : vector<1x8x256xf32> to vector<8x256xf32>
    %164 = vector.broadcast %150 : vector<1x256xf32> to vector<8x256xf32>
    %165 = arith.mulf %164, %163 : vector<8x256xf32>
    %166 = arith.addf %149, %165 : vector<8x256xf32>
    %167 = vector.extract_strided_slice %1 {offsets = [2, 0, 0], sizes = [1, 8, 256], strides = [1, 1, 1]} : vector<4x8x256xf32> to vector<1x8x256xf32>
    %168 = vector.shape_cast %167 : vector<1x8x256xf32> to vector<8x256xf32>
    %169 = vector.broadcast %151 : vector<1x256xf32> to vector<8x256xf32>
    %170 = arith.mulf %169, %168 : vector<8x256xf32>
    %171 = arith.addf %166, %170 : vector<8x256xf32>
    %172 = vector.extract_strided_slice %103 {offsets = [3, 0], sizes = [1, 256], strides = [1, 1]} : vector<8x256xf32> to vector<1x256xf32>
    %173 = vector.extract_strided_slice %103 {offsets = [7, 0], sizes = [1, 256], strides = [1, 1]} : vector<8x256xf32> to vector<1x256xf32>
    %174 = vector.extract_strided_slice %1 {offsets = [3, 0, 0], sizes = [1, 8, 256], strides = [1, 1, 1]} : vector<4x8x256xf32> to vector<1x8x256xf32>
    %175 = vector.shape_cast %174 : vector<1x8x256xf32> to vector<8x256xf32>
    %176 = vector.broadcast %172 : vector<1x256xf32> to vector<8x256xf32>
    %177 = arith.mulf %176, %175 : vector<8x256xf32>
    %178 = arith.addf %161, %177 : vector<8x256xf32>
    %179 = vector.extract_strided_slice %3 {offsets = [3, 0, 0], sizes = [1, 8, 256], strides = [1, 1, 1]} : vector<4x8x256xf32> to vector<1x8x256xf32>
    %180 = vector.shape_cast %179 : vector<1x8x256xf32> to vector<8x256xf32>
    %181 = vector.broadcast %173 : vector<1x256xf32> to vector<8x256xf32>
    %182 = arith.mulf %181, %180 : vector<8x256xf32>
    %183 = arith.subf %178, %182 : vector<8x256xf32>
    %184 = vector.extract_strided_slice %3 {offsets = [3, 0, 0], sizes = [1, 8, 256], strides = [1, 1, 1]} : vector<4x8x256xf32> to vector<1x8x256xf32>
    %185 = vector.shape_cast %184 : vector<1x8x256xf32> to vector<8x256xf32>
    %186 = vector.broadcast %172 : vector<1x256xf32> to vector<8x256xf32>
    %187 = arith.mulf %186, %185 : vector<8x256xf32>
    %188 = arith.addf %171, %187 : vector<8x256xf32>
    %189 = vector.extract_strided_slice %1 {offsets = [3, 0, 0], sizes = [1, 8, 256], strides = [1, 1, 1]} : vector<4x8x256xf32> to vector<1x8x256xf32>
    %190 = vector.shape_cast %189 : vector<1x8x256xf32> to vector<8x256xf32>
    %191 = vector.broadcast %173 : vector<1x256xf32> to vector<8x256xf32>
    %192 = arith.mulf %191, %190 : vector<8x256xf32>
    %193 = arith.addf %188, %192 : vector<8x256xf32>
    %c0_25 = arith.constant 0 : index
    %c1_26 = arith.constant 1 : index
    %c0_27 = arith.constant 0 : index
    %c0_28 = arith.constant 0 : index
    %194 = vector.load %arg4[%c0_25, %c1_26, %c0_27, %c0_28] : memref<1x2x8x256xf32, #tpu.memory_space<vmem>>, vector<1x1x8x256xf32>
    %195 = vector.shape_cast %194 : vector<1x1x8x256xf32> to vector<8x256xf32>
    %196 = vector.shape_cast %183 : vector<8x256xf32> to vector<1x1x8x256xf32>
    tpu.vector_store %arg4[%c0_25, %c1_26, %c0_27, %c0_28], %196 {strides = array<i32>} : memref<1x2x8x256xf32, #tpu.memory_space<vmem>>, vector<1x1x8x256xf32>,
    %c0_29 = arith.constant 0 : index
    %c1_30 = arith.constant 1 : index
    %c0_31 = arith.constant 0 : index
    %c0_32 = arith.constant 0 : index
    %197 = vector.load %arg5[%c0_29, %c1_30, %c0_31, %c0_32] : memref<1x2x8x256xf32, #tpu.memory_space<vmem>>, vector<1x1x8x256xf32>
    %198 = vector.shape_cast %197 : vector<1x1x8x256xf32> to vector<8x256xf32>
    %199 = vector.shape_cast %193 : vector<8x256xf32> to vector<1x1x8x256xf32>
    tpu.vector_store %arg5[%c0_29, %c1_30, %c0_31, %c0_32], %199 {strides = array<i32>} : memref<1x2x8x256xf32, #tpu.memory_space<vmem>>, vector<1x1x8x256xf32>,
    return
  }
  func.func @transform_0(%arg0: i32) -> (i32, i32, i32, i32) {
    %c0_i32 = arith.constant 0 : i32
    %c0_i32_0 = arith.constant 0 : i32
    %c0_i32_1 = arith.constant 0 : i32
    %c0_i32_2 = arith.constant 0 : i32
    return %arg0, %c0_i32, %c0_i32_0, %c0_i32_1 : i32, i32, i32, i32
  }
  func.func @transform_1(%arg0: i32) -> (i32, i32, i32, i32) {
    %c0_i32 = arith.constant 0 : i32
    %c0_i32_0 = arith.constant 0 : i32
    %c0_i32_1 = arith.constant 0 : i32
    %c0_i32_2 = arith.constant 0 : i32
    return %arg0, %c0_i32, %c0_i32_0, %c0_i32_1 : i32, i32, i32, i32
  }
  func.func @transform_2(%arg0: i32) -> (i32, i32, i32, i32) {
    %c0_i32 = arith.constant 0 : i32
    %c0_i32_0 = arith.constant 0 : i32
    %c0_i32_1 = arith.constant 0 : i32
    %c0_i32_2 = arith.constant 0 : i32
    return %arg0, %c0_i32, %c0_i32_0, %c0_i32_1 : i32, i32, i32, i32
  }
  func.func @transform_3(%arg0: i32) -> (i32, i32, i32, i32) {
    %c0_i32 = arith.constant 0 : i32
    %c0_i32_0 = arith.constant 0 : i32
    %c0_i32_1 = arith.constant 0 : i32
    %c0_i32_2 = arith.constant 0 : i32
    return %arg0, %c0_i32, %c0_i32_0, %c0_i32_1 : i32, i32, i32, i32
  }
  func.func @transform_4(%arg0: i32) -> (i32, i32, i32, i32) {
    %c0_i32 = arith.constant 0 : i32
    %c0_i32_0 = arith.constant 0 : i32
    %c0_i32_1 = arith.constant 0 : i32
    %c0_i32_2 = arith.constant 0 : i32
    return %arg0, %c0_i32, %c0_i32_0, %c0_i32_1 : i32, i32, i32, i32
  }
}

module attributes {stable_mosaic.version = 11 : i64} {
  func.func @_channel_mix_kernel(%arg0: i32, %arg1: i32, %arg2: memref<1x4x2048xf32, #tpu.memory_space<vmem>>, %arg3: memref<8x4xf32, #tpu.memory_space<vmem>>, %arg4: memref<1x8x2048xf32, #tpu.memory_space<vmem>>) attributes {dimension_semantics = [#tpu.dimension_semantics<parallel>, #tpu.dimension_semantics<parallel>], iteration_bounds = array<i64: 2, 1>, scalar_prefetch = 0 : i64, scratch_operands = 0 : i64, tpu.core_type = #tpu.core_type<tc>, window_params = [{transform_indices = @transform_0, window_bounds = array<i64: 1, 4, 2048>}, {pipeline_mode = #tpu.pipeline_mode<synchronous>, transform_indices = @transform_1, window_bounds = array<i64: 8, 4>}, {transform_indices = @transform_2, window_bounds = array<i64: 1, 8, 2048>}]} {
    %c0 = arith.constant 0 : index
    %c0_0 = arith.constant 0 : index
    %c0_1 = arith.constant 0 : index
    %0 = vector.load %arg2[%c0, %c0_0, %c0_1] : memref<1x4x2048xf32, #tpu.memory_space<vmem>>, vector<1x4x2048xf32>
    %1 = vector.shape_cast %0 : vector<1x4x2048xf32> to vector<4x2048xf32>
    %c0_2 = arith.constant 0 : index
    %c0_3 = arith.constant 0 : index
    %2 = vector.load %arg3[%c0_2, %c0_3] : memref<8x4xf32, #tpu.memory_space<vmem>>, vector<8x4xf32>
    %cst = arith.constant 0.000000e+00 : f32
    %3 = vector.broadcast %cst : f32 to vector<8x2048xf32>
    %4 = vector.extract_strided_slice %2 {offsets = [0, 0], sizes = [8, 1], strides = [1, 1]} : vector<8x4xf32> to vector<8x1xf32>
    %5 = vector.extract_strided_slice %1 {offsets = [0, 0], sizes = [1, 2048], strides = [1, 1]} : vector<4x2048xf32> to vector<1x2048xf32>
    %6 = vector.broadcast %4 : vector<8x1xf32> to vector<8x2048xf32>
    %7 = vector.broadcast %5 : vector<1x2048xf32> to vector<8x2048xf32>
    %8 = arith.mulf %6, %7 : vector<8x2048xf32>
    %9 = arith.addf %3, %8 : vector<8x2048xf32>
    %10 = vector.extract_strided_slice %2 {offsets = [0, 1], sizes = [8, 1], strides = [1, 1]} : vector<8x4xf32> to vector<8x1xf32>
    %11 = vector.extract_strided_slice %1 {offsets = [1, 0], sizes = [1, 2048], strides = [1, 1]} : vector<4x2048xf32> to vector<1x2048xf32>
    %12 = vector.broadcast %10 : vector<8x1xf32> to vector<8x2048xf32>
    %13 = vector.broadcast %11 : vector<1x2048xf32> to vector<8x2048xf32>
    %14 = arith.mulf %12, %13 : vector<8x2048xf32>
    %15 = arith.addf %9, %14 : vector<8x2048xf32>
    %16 = vector.extract_strided_slice %2 {offsets = [0, 2], sizes = [8, 1], strides = [1, 1]} : vector<8x4xf32> to vector<8x1xf32>
    %17 = vector.extract_strided_slice %1 {offsets = [2, 0], sizes = [1, 2048], strides = [1, 1]} : vector<4x2048xf32> to vector<1x2048xf32>
    %18 = vector.broadcast %16 : vector<8x1xf32> to vector<8x2048xf32>
    %19 = vector.broadcast %17 : vector<1x2048xf32> to vector<8x2048xf32>
    %20 = arith.mulf %18, %19 : vector<8x2048xf32>
    %21 = arith.addf %15, %20 : vector<8x2048xf32>
    %22 = vector.extract_strided_slice %2 {offsets = [0, 3], sizes = [8, 1], strides = [1, 1]} : vector<8x4xf32> to vector<8x1xf32>
    %23 = vector.extract_strided_slice %1 {offsets = [3, 0], sizes = [1, 2048], strides = [1, 1]} : vector<4x2048xf32> to vector<1x2048xf32>
    %24 = vector.broadcast %22 : vector<8x1xf32> to vector<8x2048xf32>
    %25 = vector.broadcast %23 : vector<1x2048xf32> to vector<8x2048xf32>
    %26 = arith.mulf %24, %25 : vector<8x2048xf32>
    %27 = arith.addf %21, %26 : vector<8x2048xf32>
    %c0_4 = arith.constant 0 : index
    %c0_5 = arith.constant 0 : index
    %c0_6 = arith.constant 0 : index
    %28 = vector.load %arg4[%c0_4, %c0_5, %c0_6] : memref<1x8x2048xf32, #tpu.memory_space<vmem>>, vector<1x8x2048xf32>
    %29 = vector.shape_cast %28 : vector<1x8x2048xf32> to vector<8x2048xf32>
    %30 = vector.shape_cast %27 : vector<8x2048xf32> to vector<1x8x2048xf32>
    tpu.vector_store %arg4[%c0_4, %c0_5, %c0_6], %30 {strides = array<i32>} : memref<1x8x2048xf32, #tpu.memory_space<vmem>>, vector<1x8x2048xf32>,
    return
  }
  func.func @transform_0(%arg0: i32, %arg1: i32) -> (i32, i32, i32) {
    %c0_i32 = arith.constant 0 : i32
    %c0_i32_0 = arith.constant 0 : i32
    return %arg0, %c0_i32, %arg1 : i32, i32, i32
  }
  func.func @transform_1(%arg0: i32, %arg1: i32) -> (i32, i32) {
    %c0_i32 = arith.constant 0 : i32
    %c0_i32_0 = arith.constant 0 : i32
    %c0_i32_1 = arith.constant 0 : i32
    return %c0_i32, %c0_i32_0 : i32, i32
  }
  func.func @transform_2(%arg0: i32, %arg1: i32) -> (i32, i32, i32) {
    %c0_i32 = arith.constant 0 : i32
    %c0_i32_0 = arith.constant 0 : i32
    return %arg0, %c0_i32, %arg1 : i32, i32, i32
  }
}

module attributes {stable_mosaic.version = 11 : i64} {
  func.func @_in_stats_kernel(%arg0: i32, %arg1: i32, %arg2: memref<1x8x2048xf32, #tpu.memory_space<vmem>>, %arg3: memref<1x8x1xf32, #tpu.memory_space<vmem>>, %arg4: memref<1x8x1xf32, #tpu.memory_space<vmem>>) attributes {dimension_semantics = [#tpu.dimension_semantics<parallel>, #tpu.dimension_semantics<arbitrary>], iteration_bounds = array<i64: 2, 1>, scalar_prefetch = 0 : i64, scratch_operands = 0 : i64, tpu.core_type = #tpu.core_type<tc>, window_params = [{transform_indices = @transform_0, window_bounds = array<i64: 1, 8, 2048>}, {transform_indices = @transform_1, window_bounds = array<i64: 1, 8, 1>}, {transform_indices = @transform_2, window_bounds = array<i64: 1, 8, 1>}]} {
    %c0_i32 = arith.constant 0 : i32
    %0 = arith.cmpi eq, %arg1, %c0_i32 : i32
    %1 = arith.extui %0 : i1 to i32
    %c0_i32_0 = arith.constant 0 : i32
    %2 = arith.cmpi ne, %1, %c0_i32_0 : i32
    scf.if %2 {
      %cst_16 = arith.constant 0.000000e+00 : f32
      %22 = vector.broadcast %cst_16 : f32 to vector<8x1xf32>
      %c0_17 = arith.constant 0 : index
      %c0_18 = arith.constant 0 : index
      %c0_19 = arith.constant 0 : index
      %23 = vector.load %arg3[%c0_17, %c0_18, %c0_19] : memref<1x8x1xf32, #tpu.memory_space<vmem>>, vector<1x8x1xf32>
      %24 = vector.shape_cast %23 : vector<1x8x1xf32> to vector<8x1xf32>
      %25 = vector.shape_cast %22 : vector<8x1xf32> to vector<1x8x1xf32>
      tpu.vector_store %arg3[%c0_17, %c0_18, %c0_19], %25 {strides = array<i32>} : memref<1x8x1xf32, #tpu.memory_space<vmem>>, vector<1x8x1xf32>,
      %cst_20 = arith.constant 0.000000e+00 : f32
      %26 = vector.broadcast %cst_20 : f32 to vector<8x1xf32>
      %c0_21 = arith.constant 0 : index
      %c0_22 = arith.constant 0 : index
      %c0_23 = arith.constant 0 : index
      %27 = vector.load %arg4[%c0_21, %c0_22, %c0_23] : memref<1x8x1xf32, #tpu.memory_space<vmem>>, vector<1x8x1xf32>
      %28 = vector.shape_cast %27 : vector<1x8x1xf32> to vector<8x1xf32>
      %29 = vector.shape_cast %26 : vector<8x1xf32> to vector<1x8x1xf32>
      tpu.vector_store %arg4[%c0_21, %c0_22, %c0_23], %29 {strides = array<i32>} : memref<1x8x1xf32, #tpu.memory_space<vmem>>, vector<1x8x1xf32>,
    } else {
    }
    %c0 = arith.constant 0 : index
    %c0_1 = arith.constant 0 : index
    %c0_2 = arith.constant 0 : index
    %3 = vector.load %arg2[%c0, %c0_1, %c0_2] : memref<1x8x2048xf32, #tpu.memory_space<vmem>>, vector<1x8x2048xf32>
    %4 = vector.shape_cast %3 : vector<1x8x2048xf32> to vector<8x2048xf32>
    %c0_3 = arith.constant 0 : index
    %c0_4 = arith.constant 0 : index
    %c0_5 = arith.constant 0 : index
    %5 = vector.load %arg3[%c0_3, %c0_4, %c0_5] : memref<1x8x1xf32, #tpu.memory_space<vmem>>, vector<1x8x1xf32>
    %6 = vector.shape_cast %5 : vector<1x8x1xf32> to vector<8x1xf32>
    %cst = arith.constant dense<0.000000e+00> : vector<8xf32>
    %7 = vector.multi_reduction <add>, %4, %cst [1] : vector<8x2048xf32> to vector<8xf32>
    %8 = vector.shape_cast %7 : vector<8xf32> to vector<8x1xf32>
    %9 = arith.addf %6, %8 : vector<8x1xf32>
    %c0_6 = arith.constant 0 : index
    %c0_7 = arith.constant 0 : index
    %c0_8 = arith.constant 0 : index
    %10 = vector.load %arg3[%c0_6, %c0_7, %c0_8] : memref<1x8x1xf32, #tpu.memory_space<vmem>>, vector<1x8x1xf32>
    %11 = vector.shape_cast %10 : vector<1x8x1xf32> to vector<8x1xf32>
    %12 = vector.shape_cast %9 : vector<8x1xf32> to vector<1x8x1xf32>
    tpu.vector_store %arg3[%c0_6, %c0_7, %c0_8], %12 {strides = array<i32>} : memref<1x8x1xf32, #tpu.memory_space<vmem>>, vector<1x8x1xf32>,
    %c0_9 = arith.constant 0 : index
    %c0_10 = arith.constant 0 : index
    %c0_11 = arith.constant 0 : index
    %13 = vector.load %arg4[%c0_9, %c0_10, %c0_11] : memref<1x8x1xf32, #tpu.memory_space<vmem>>, vector<1x8x1xf32>
    %14 = vector.shape_cast %13 : vector<1x8x1xf32> to vector<8x1xf32>
    %15 = arith.mulf %4, %4 : vector<8x2048xf32>
    %cst_12 = arith.constant dense<0.000000e+00> : vector<8xf32>
    %16 = vector.multi_reduction <add>, %15, %cst_12 [1] : vector<8x2048xf32> to vector<8xf32>
    %17 = vector.shape_cast %16 : vector<8xf32> to vector<8x1xf32>
    %18 = arith.addf %14, %17 : vector<8x1xf32>
    %c0_13 = arith.constant 0 : index
    %c0_14 = arith.constant 0 : index
    %c0_15 = arith.constant 0 : index
    %19 = vector.load %arg4[%c0_13, %c0_14, %c0_15] : memref<1x8x1xf32, #tpu.memory_space<vmem>>, vector<1x8x1xf32>
    %20 = vector.shape_cast %19 : vector<1x8x1xf32> to vector<8x1xf32>
    %21 = vector.shape_cast %18 : vector<8x1xf32> to vector<1x8x1xf32>
    tpu.vector_store %arg4[%c0_13, %c0_14, %c0_15], %21 {strides = array<i32>} : memref<1x8x1xf32, #tpu.memory_space<vmem>>, vector<1x8x1xf32>,
    return
  }
  func.func @transform_0(%arg0: i32, %arg1: i32) -> (i32, i32, i32) {
    %c0_i32 = arith.constant 0 : i32
    %c0_i32_0 = arith.constant 0 : i32
    return %arg0, %c0_i32, %arg1 : i32, i32, i32
  }
  func.func @transform_1(%arg0: i32, %arg1: i32) -> (i32, i32, i32) {
    %c0_i32 = arith.constant 0 : i32
    %c0_i32_0 = arith.constant 0 : i32
    %c0_i32_1 = arith.constant 0 : i32
    return %arg0, %c0_i32, %c0_i32_0 : i32, i32, i32
  }
  func.func @transform_2(%arg0: i32, %arg1: i32) -> (i32, i32, i32) {
    %c0_i32 = arith.constant 0 : i32
    %c0_i32_0 = arith.constant 0 : i32
    %c0_i32_1 = arith.constant 0 : i32
    return %arg0, %c0_i32, %c0_i32_0 : i32, i32, i32
  }
}

module attributes {stable_mosaic.version = 11 : i64} {
  func.func @_in_norm_gelu_kernel(%arg0: i32, %arg1: i32, %arg2: memref<1x8x2048xf32, #tpu.memory_space<vmem>>, %arg3: memref<1x8x1xf32, #tpu.memory_space<vmem>>, %arg4: memref<1x8x1xf32, #tpu.memory_space<vmem>>, %arg5: memref<8x1xf32, #tpu.memory_space<vmem>>, %arg6: memref<8x1xf32, #tpu.memory_space<vmem>>, %arg7: memref<1x8x2048xf32, #tpu.memory_space<vmem>>) attributes {dimension_semantics = [#tpu.dimension_semantics<parallel>, #tpu.dimension_semantics<parallel>], iteration_bounds = array<i64: 2, 1>, scalar_prefetch = 0 : i64, scratch_operands = 0 : i64, tpu.core_type = #tpu.core_type<tc>, window_params = [{transform_indices = @transform_0, window_bounds = array<i64: 1, 8, 2048>}, {transform_indices = @transform_1, window_bounds = array<i64: 1, 8, 1>}, {transform_indices = @transform_2, window_bounds = array<i64: 1, 8, 1>}, {pipeline_mode = #tpu.pipeline_mode<synchronous>, transform_indices = @transform_3, window_bounds = array<i64: 8, 1>}, {pipeline_mode = #tpu.pipeline_mode<synchronous>, transform_indices = @transform_4, window_bounds = array<i64: 8, 1>}, {transform_indices = @transform_5, window_bounds = array<i64: 1, 8, 2048>}]} {
    %c0 = arith.constant 0 : index
    %c0_0 = arith.constant 0 : index
    %c0_1 = arith.constant 0 : index
    %0 = vector.load %arg3[%c0, %c0_0, %c0_1] : memref<1x8x1xf32, #tpu.memory_space<vmem>>, vector<1x8x1xf32>
    %1 = vector.shape_cast %0 : vector<1x8x1xf32> to vector<8x1xf32>
    %cst = arith.constant 4.8828125E-4 : f32
    %2 = vector.broadcast %cst : f32 to vector<8x1xf32>
    %3 = arith.mulf %1, %2 : vector<8x1xf32>
    %c0_2 = arith.constant 0 : index
    %c0_3 = arith.constant 0 : index
    %c0_4 = arith.constant 0 : index
    %4 = vector.load %arg4[%c0_2, %c0_3, %c0_4] : memref<1x8x1xf32, #tpu.memory_space<vmem>>, vector<1x8x1xf32>
    %5 = vector.shape_cast %4 : vector<1x8x1xf32> to vector<8x1xf32>
    %cst_5 = arith.constant 4.8828125E-4 : f32
    %6 = vector.broadcast %cst_5 : f32 to vector<8x1xf32>
    %7 = arith.mulf %5, %6 : vector<8x1xf32>
    %8 = arith.mulf %3, %3 : vector<8x1xf32>
    %9 = arith.subf %7, %8 : vector<8x1xf32>
    %cst_6 = arith.constant 9.99999974E-6 : f32
    %10 = vector.broadcast %cst_6 : f32 to vector<8x1xf32>
    %11 = arith.addf %9, %10 : vector<8x1xf32>
    %12 = math.rsqrt %11 : vector<8x1xf32>
    %c0_7 = arith.constant 0 : index
    %c0_8 = arith.constant 0 : index
    %13 = vector.load %arg5[%c0_7, %c0_8] : memref<8x1xf32, #tpu.memory_space<vmem>>, vector<8x1xf32>
    %14 = arith.mulf %12, %13 : vector<8x1xf32>
    %c0_9 = arith.constant 0 : index
    %c0_10 = arith.constant 0 : index
    %c0_11 = arith.constant 0 : index
    %15 = vector.load %arg2[%c0_9, %c0_10, %c0_11] : memref<1x8x2048xf32, #tpu.memory_space<vmem>>, vector<1x8x2048xf32>
    %16 = vector.shape_cast %15 : vector<1x8x2048xf32> to vector<8x2048xf32>
    %17 = vector.broadcast %3 : vector<8x1xf32> to vector<8x2048xf32>
    %18 = arith.subf %16, %17 : vector<8x2048xf32>
    %19 = vector.broadcast %14 : vector<8x1xf32> to vector<8x2048xf32>
    %20 = arith.mulf %18, %19 : vector<8x2048xf32>
    %c0_12 = arith.constant 0 : index
    %c0_13 = arith.constant 0 : index
    %21 = vector.load %arg6[%c0_12, %c0_13] : memref<8x1xf32, #tpu.memory_space<vmem>>, vector<8x1xf32>
    %22 = vector.broadcast %21 : vector<8x1xf32> to vector<8x2048xf32>
    %23 = arith.addf %20, %22 : vector<8x2048xf32>
    %cst_14 = arith.constant 5.000000e-01 : f32
    %24 = vector.broadcast %cst_14 : f32 to vector<8x2048xf32>
    %25 = arith.mulf %24, %23 : vector<8x2048xf32>
    %cst_15 = arith.constant 0.707106769 : f32
    %26 = vector.broadcast %cst_15 : f32 to vector<8x2048xf32>
    %27 = arith.mulf %23, %26 : vector<8x2048xf32>
    %28 = math.erf %27 : vector<8x2048xf32>
    %cst_16 = arith.constant 1.000000e+00 : f32
    %29 = vector.broadcast %cst_16 : f32 to vector<8x2048xf32>
    %30 = arith.addf %29, %28 : vector<8x2048xf32>
    %31 = arith.mulf %25, %30 : vector<8x2048xf32>
    %c0_17 = arith.constant 0 : index
    %c0_18 = arith.constant 0 : index
    %c0_19 = arith.constant 0 : index
    %32 = vector.load %arg7[%c0_17, %c0_18, %c0_19] : memref<1x8x2048xf32, #tpu.memory_space<vmem>>, vector<1x8x2048xf32>
    %33 = vector.shape_cast %32 : vector<1x8x2048xf32> to vector<8x2048xf32>
    %34 = vector.shape_cast %31 : vector<8x2048xf32> to vector<1x8x2048xf32>
    tpu.vector_store %arg7[%c0_17, %c0_18, %c0_19], %34 {strides = array<i32>} : memref<1x8x2048xf32, #tpu.memory_space<vmem>>, vector<1x8x2048xf32>,
    return
  }
  func.func @transform_0(%arg0: i32, %arg1: i32) -> (i32, i32, i32) {
    %c0_i32 = arith.constant 0 : i32
    %c0_i32_0 = arith.constant 0 : i32
    return %arg0, %c0_i32, %arg1 : i32, i32, i32
  }
  func.func @transform_1(%arg0: i32, %arg1: i32) -> (i32, i32, i32) {
    %c0_i32 = arith.constant 0 : i32
    %c0_i32_0 = arith.constant 0 : i32
    %c0_i32_1 = arith.constant 0 : i32
    return %arg0, %c0_i32, %c0_i32_0 : i32, i32, i32
  }
  func.func @transform_2(%arg0: i32, %arg1: i32) -> (i32, i32, i32) {
    %c0_i32 = arith.constant 0 : i32
    %c0_i32_0 = arith.constant 0 : i32
    %c0_i32_1 = arith.constant 0 : i32
    return %arg0, %c0_i32, %c0_i32_0 : i32, i32, i32
  }
  func.func @transform_3(%arg0: i32, %arg1: i32) -> (i32, i32) {
    %c0_i32 = arith.constant 0 : i32
    %c0_i32_0 = arith.constant 0 : i32
    %c0_i32_1 = arith.constant 0 : i32
    return %c0_i32, %c0_i32_0 : i32, i32
  }
  func.func @transform_4(%arg0: i32, %arg1: i32) -> (i32, i32) {
    %c0_i32 = arith.constant 0 : i32
    %c0_i32_0 = arith.constant 0 : i32
    %c0_i32_1 = arith.constant 0 : i32
    return %c0_i32, %c0_i32_0 : i32, i32
  }
  func.func @transform_5(%arg0: i32, %arg1: i32) -> (i32, i32, i32) {
    %c0_i32 = arith.constant 0 : i32
    %c0_i32_0 = arith.constant 0 : i32
    return %arg0, %c0_i32, %arg1 : i32, i32, i32
  }
}

</mosaic_0001>

<bundles_post_ra>
// kernel: operator_block_3d_forward.4
= control target key start
LH: loop header
LB: loop body
LE: loop exit
PB: predicated region body
PF: predicated region fallthrough
CT: control target
= control target key end

     0   :  { %s719_s15 = smov 0   ;;  %s936_s0 = inlined_call_operand.vmem [shape: f32[4,2,8,256], index: 0, kind: input, shape index: {}]   ;;  %s937_s1 = inlined_call_operand.vmem [shape: f32[4,4,8,256], index: 1, kind: input, shape index: {}]   ;;  %s938_s2 = inlined_call_operand.vmem [shape: f32[4,4,8,256], index: 2, kind: input, shape index: {}]   ;;  %s939_s3 = inlined_call_operand.vmem [shape: f32[4,2,8,256], index: 3, kind: output, shape index: {0}]   ;;  %s940_s4 = inlined_call_operand.vmem [shape: f32[4,2,8,256], index: 4, kind: output, shape index: {1}]  }
   0x1 LB: > { %s650_s16 = sadd.s32 4294967295, %s692_s15   ;;  %p654_p0 = scmp.ge.s32.totalorder %s692_s15, 1  ;;  %s692_s15 = sphi %s719_s15, %s15_s15  }
   0x2   : > { %p185_p1 = scmp.lt.s32.totalorder %s692_s15, 5 }
   0x4   : > { %p186_p2 = pnand %p654_p0, %p185_p1 }
   0x5   : > { %p226_p3 = scmp.lt.s32.totalorder (!%p186_p2), %s650_s16, 3  ;;  %v269_v0 = vlaneseq (!%p186_p2) }
   0x6   : > { %189 = sbr.rel (%p186_p2) target bundleno = 64 (0x40), region = 32 }
   0x7   : > { %v270_v1 = vshrl.u32 (!%p186_p2), %v269_v0, 7 }
   0x9   : > { %v740_v2 = vsub.s32 (!%p186_p2), 0, %v270_v1  ;;  %v742_v3 = vsub.s32 (!%p186_p2), 4, %v270_v1  ;;  %v744_v4 = vsub.s32 (!%p186_p2), 1, %v270_v1  ;;  %v746_v5 = vsub.s32 (!%p186_p2), 5, %v270_v1 }
   0xa   : > { %v753_v6 = vsub.s32 (!%p186_p2), 2, %v270_v1  ;;  %v755_v7 = vsub.s32 (!%p186_p2), 6, %v270_v1  ;;  %v760_v9 = vsub.s32 (!%p186_p2), 3, %v270_v1  ;;  %v769_v13 = vsub.s32 (!%p186_p2), 7, %v270_v1 }
   0xd   : > { %s942_s16 = smov (!%p226_p3, %s650_s16), 3 }
   0xe   : > { %s727_s17 = sshll.u32 %s942_s16, 5  ;;  %s674_s18 = sshll.u32 %s942_s16, 6 }
   0xf   : > { %s733_s21 = scalar_lea.vmem %s936_s0, %s727_s17  ;;  %s738_s24 = scalar_lea.vmem %s937_s1, %s674_s18 }
  0x10   : > { %s751_s27 = scalar_lea.vmem %s938_s2, %s674_s18  ;;  %v758_v8 = vld [vmem:[%s738_s24] sm:$0xff]  ;;  %v763_v10 = vld [vmem:[%s738_s24 + $0x10] sm:$0xff]  ;;  %v268_v19 = vld [vmem:[%s733_s21 + $0x8] sm:$0xff]  ;;  %s864_s30 = scalar_lea.vmem %s939_s3, %s727_s17 }
  0x11   : > { %v766_v11 = vld [vmem:[%s751_s27] sm:$0xff]  ;;  %v782_v22 = vld [vmem:[%s751_s27 + $0x10] sm:$0xff]  ;;  %v796_v32 = vld [vmem:[%s738_s24 + $0x8] sm:$0xff]  ;;  %v276_v38 = vrot.slane %v268_v19, %v740_v2  ;;  %v288_v39 = vrot.slane %v268_v19, %v742_v3  ;;  %v308_v40 = vrot.slane %v268_v19, %v744_v4  ;;  %v320_v41 = vrot.slane %v268_v19, %v746_v5  ;;  %s889_s7 = scalar_lea.vmem %s940_s4, %s727_s17 }
  0x12   : > { %v267_v12 = vld [vmem:[%s733_s21] sm:$0xff]  ;;  %v799_v33 = vld [vmem:[%s738_s24 + $0x18] sm:$0xff]  ;;  %v802_v34 = vld [vmem:[%s751_s27 + $0x8] sm:$0xff]  ;;  %v340_v42 = vrot.slane %v268_v19, %v753_v6  ;;  %v352_v43 = vrot.slane %v268_v19, %v755_v7  ;;  %v817_v44 = vrot.slane %v268_v19, %v760_v9  ;;  %v384_v59 = vrot.slane %v268_v19, %v769_v13 }
  0x13   : > { %v772_v14 = vld [vmem:[%s738_s24 + $0x20] sm:$0xff]  ;;  %v272_v15 = vrot.slane %v267_v12, %v740_v2  ;;  %v284_v16 = vrot.slane %v267_v12, %v742_v3  ;;  %v304_v17 = vrot.slane %v267_v12, %v744_v4  ;;  %v316_v18 = vrot.slane %v267_v12, %v746_v5  ;;  %v805_v35 = vld [vmem:[%s738_s24 + $0x30] sm:$0xff]  ;;  %v808_v37 = vld [vmem:[%s738_s24 + $0x28] sm:$0xff] }
  0x14   : > { %v336_v20 = vrot.slane %v267_v12, %v753_v6  ;;  %v348_v21 = vrot.slane %v267_v12, %v755_v7  ;;  %v785_v23 = vld [vmem:[%s751_s27 + $0x20] sm:$0xff]  ;;  %v368_v27 = vrot.slane %v267_v12, %v760_v9  ;;  %v380_v31 = vrot.slane %v267_v12, %v769_v13  ;;  %v820_v45 = vld [vmem:[%s751_s27 + $0x30] sm:$0xff]  ;;  %v823_v47 = vld [vmem:[%s738_s24 + $0x38] sm:$0xff] }
  0x15   : > { %v277_v24 = vmul.f32 %v272_v15, %v758_v8  ;;  %v289_v25 = vmul.f32 %v284_v16, %v766_v11  ;;  %v309_v26 = vmul.f32 %v304_v17, %v763_v10  ;;  %v321_v28 = vmul.f32 %v316_v18, %v782_v22  ;;  %v826_v48 = vld [vmem:[%s751_s27 + $0x18] sm:$0xff]  ;;  %v836_v57 = vld [vmem:[%s751_s27 + $0x28] sm:$0xff] }
  0x16   : > { %v341_v29 = vmul.f32 %v336_v20, %v772_v14  ;;  %v353_v30 = vmul.f32 %v348_v21, %v785_v23  ;;  %v278_v49 = vmul.f32 %v276_v38, %v796_v32  ;;  %v290_v50 = vmul.f32 %v288_v39, %v802_v34  ;;  %v846_v12 = vld [vmem:[%s751_s27 + $0x38] sm:$0xff] }
  0x17   : > { %v291_v36 = vsub.f32 %v277_v24, %v289_v25  ;;  %v310_v51 = vmul.f32 %v308_v40, %v799_v33  ;;  %v373_v52 = vmul.f32 %v368_v27, %v805_v35  ;;  %v385_v53 = vmul.f32 %v380_v31, %v820_v45 }
  0x18   : > { %v322_v54 = vmul.f32 %v320_v41, %v826_v48  ;;  %v342_v55 = vmul.f32 %v340_v42, %v808_v37  ;;  %v292_v58 = vsub.f32 %v278_v49, %v290_v50  ;;  %v293_v60 = vmul.f32 %v272_v15, %v766_v11 }
  0x19   : > { %v311_v46 = vadd.f32 %v309_v26, %v291_v36  ;;  %v354_v61 = vmul.f32 %v352_v43, %v836_v57  ;;  %v374_v62 = vmul.f32 %v817_v44, %v823_v47  ;;  %v297_v63 = vmul.f32 %v284_v16, %v758_v8  ;;  %v665_v16 = vld [vmem:[%s733_s21 + $0x10] sm:$0xff] }
  0x1a   : > { %v325_v0 = vmul.f32 %v304_v17, %v782_v22  ;;  %v312_v24 = vadd.f32 %v310_v51, %v292_v58  ;;  %v329_v25 = vmul.f32 %v316_v18, %v763_v10  ;;  %v357_v19 = vmul.f32 %v336_v20, %v785_v23 }
  0x1b   : > { %v323_v56 = vsub.f32 %v311_v46, %v321_v28  ;;  %v386_v26 = vmul.f32 %v384_v59, %v846_v12  ;;  %v299_v15 = vadd.f32 %v297_v63, %v293_v60  ;;  %v361_v28 = vmul.f32 %v348_v21, %v772_v14 }
  0x1c   : > { %v294_v36 = vmul.f32 %v276_v38, %v802_v34  ;;  %v324_v49 = vsub.f32 %v312_v24, %v322_v54  ;;  %v298_v17 = vmul.f32 %v288_v39, %v796_v32  ;;  %v389_v18 = vmul.f32 %v368_v27, %v820_v45 }
  0x1d   : > { %v343_v1 = vadd.f32 %v341_v29, %v323_v56  ;;  %v326_v29 = vmul.f32 %v308_v40, %v826_v48  ;;  %v327_v50 = vadd.f32 %v325_v0, %v299_v15  ;;  %v393_v20 = vmul.f32 %v380_v31, %v805_v35 }
  0x1e   : > { %v330_v51 = vmul.f32 %v320_v41, %v799_v33  ;;  %v344_v58 = vadd.f32 %v342_v55, %v324_v49  ;;  %v300_v60 = vadd.f32 %v298_v17, %v294_v36  ;;  %v358_v21 = vmul.f32 %v340_v42, %v836_v57 }
  0x1f   : > { %v355_v46 = vsub.f32 %v343_v1, %v353_v30  ;;  %v331_v30 = vadd.f32 %v329_v25, %v327_v50  ;;  %v362_v38 = vmul.f32 %v352_v43, %v808_v37  ;;  %v407_v27 = vrot.slane %v665_v16, %v740_v2 }
  0x20   : > { %v419_v31 = vrot.slane %v665_v16, %v742_v3  ;;  %v356_v40 = vsub.f32 %v344_v58, %v354_v61  ;;  %v328_v41 = vadd.f32 %v326_v29, %v300_v60  ;;  %v451_v63 = vrot.slane %v665_v16, %v746_v5  ;;  %v666_v61 = vld [vmem:[%s733_s21 + $0x18] sm:$0xff] }
  0x21   : > { %v375_v56 = vadd.f32 %v373_v52, %v355_v46  ;;  %v439_v52 = vrot.slane %v665_v16, %v744_v4  ;;  %v359_v42 = vadd.f32 %v357_v19, %v331_v30  ;;  %v412_v54 = vmul.f32 %v407_v27, %v758_v8 }
  0x22   : > { %v424_v55 = vmul.f32 %v419_v31, %v766_v11  ;;  %v376_v0 = vadd.f32 %v374_v62, %v356_v40  ;;  %v332_v43 = vadd.f32 %v330_v51, %v328_v41  ;;  %v456_v19 = vmul.f32 %v451_v63, %v782_v22 }
  0x23   : > { %v387_v39 = vsub.f32 %v375_v56, %v385_v53  ;;  %v444_v1 = vmul.f32 %v439_v52, %v763_v10  ;;  %v471_v53 = vrot.slane %v665_v16, %v753_v6  ;;  %v363_v24 = vadd.f32 %v361_v28, %v359_v42 }
  0x24   : > { %v426_v25 = vsub.f32 %v412_v54, %v424_v55  ;;  %v483_v15 = vrot.slane %v665_v16, %v755_v7  ;;  %v388_v36 = vsub.f32 %v376_v0, %v386_v26  ;;  %v360_v46 = vadd.f32 %v358_v21, %v332_v43 }
  0x25   : > { %397 = vst [vmem:[%s864_s30] sm:$0xff] %v387_v39  ;;  %v390_v49 = vmul.f32 %v817_v44, %v846_v12  ;;  %v394_v62 = vmul.f32 %v384_v59, %v823_v47  ;;  %v391_v17 = vadd.f32 %v389_v18, %v363_v24  ;;  %v476_v50 = vmul.f32 %v471_v53, %v772_v14 }
  0x26   : > { %v446_v29 = vadd.f32 %v444_v1, %v426_v25  ;;  %v503_v51 = vrot.slane %v665_v16, %v760_v9  ;;  %398 = vst [vmem:[%s864_s30 + $0x8] sm:$0xff] %v388_v36  ;;  %v364_v26 = vadd.f32 %v362_v38, %v360_v46  ;;  %v488_v28 = vmul.f32 %v483_v15, %v785_v23 }
  0x27   : > { %v411_v44 = vrot.slane %v666_v61, %v740_v2  ;;  %v423_v59 = vrot.slane %v666_v61, %v742_v3  ;;  %v395_v18 = vadd.f32 %v393_v20, %v391_v17  ;;  %v515_v58 = vrot.slane %v665_v16, %v769_v13 }
  0x28   : > { %v458_v56 = vsub.f32 %v446_v29, %v456_v19  ;;  %v443_v60 = vrot.slane %v666_v61, %v744_v4  ;;  %v392_v21 = vadd.f32 %v390_v49, %v364_v26  ;;  %v455_v38 = vrot.slane %v666_v61, %v746_v5 }
  0x29   : > { %v413_v30 = vmul.f32 %v411_v44, %v796_v32  ;;  %v425_v39 = vmul.f32 %v423_v59, %v802_v34  ;;  %399 = vst [vmem:[%s889_s7] sm:$0xff] %v395_v18  ;;  %v508_v2 = vmul.f32 %v503_v51, %v805_v35  ;;  %v475_v20 = vrot.slane %v666_v61, %v753_v6 }
  0x2a   : > { %v478_v40 = vadd.f32 %v476_v50, %v458_v56  ;;  %v445_v3 = vmul.f32 %v443_v60, %v799_v33  ;;  %v396_v41 = vadd.f32 %v394_v62, %v392_v21  ;;  %v457_v4 = vmul.f32 %v455_v38, %v826_v48 }
  0x2b   : > { %v427_v16 = vsub.f32 %v413_v30, %v425_v39  ;;  %v487_v42 = vrot.slane %v666_v61, %v755_v7  ;;  %v520_v55 = vmul.f32 %v515_v58, %v820_v45  ;;  %v507_v0 = vrot.slane %v666_v61, %v760_v9 }
  0x2c   : > { %v490_v54 = vsub.f32 %v478_v40, %v488_v28  ;;  %400 = vst [vmem:[%s889_s7 + $0x8] sm:$0xff] %v396_v41  ;;  %v477_v43 = vmul.f32 %v475_v20, %v808_v37  ;;  %v428_v1 = vmul.f32 %v407_v27, %v766_v11  ;;  %v432_v24 = vmul.f32 %v419_v31, %v758_v8 }
  0x2d   : > { %v447_v5 = vadd.f32 %v445_v3, %v427_v16  ;;  %v519_v25 = vrot.slane %v666_v61, %v769_v13  ;;  %v460_v19 = vmul.f32 %v439_v52, %v782_v22  ;;  %v489_v36 = vmul.f32 %v487_v42, %v836_v57 }
  0x2e   : > { %v510_v6 = vadd.f32 %v508_v2, %v490_v54  ;;  %v434_v46 = vadd.f32 %v432_v24, %v428_v1  ;;  %v464_v9 = vmul.f32 %v451_v63, %v763_v10  ;;  %v509_v62 = vmul.f32 %v507_v0, %v823_v47 }
  0x2f   : > { %v459_v7 = vsub.f32 %v447_v5, %v457_v4  ;;  %v492_v17 = vmul.f32 %v471_v53, %v785_v23  ;;  %v429_v11 = vmul.f32 %v411_v44, %v802_v34  ;;  %v433_v31 = vmul.f32 %v423_v59, %v796_v32 }
  0x30   : > { %v522_v49 = vsub.f32 %v510_v6, %v520_v55  ;;  %v462_v27 = vadd.f32 %v460_v19, %v434_v46  ;;  %v461_v13 = vmul.f32 %v443_v60, %v826_v48  ;;  %v521_v22 = vmul.f32 %v519_v25, %v846_v12 }
  0x31   : > { %v479_v8 = vadd.f32 %v477_v43, %v459_v7  ;;  %v496_v52 = vmul.f32 %v483_v15, %v772_v14  ;;  %v435_v61 = vadd.f32 %v433_v31, %v429_v11  ;;  %v465_v29 = vmul.f32 %v455_v38, %v799_v33 }
  0x32   : > { %667 = vst [vmem:[%s864_s30 + $0x10] sm:$0xff] %v522_v49  ;;  %v466_v63 = vadd.f32 %v464_v9, %v462_v27  ;;  %v524_v23 = vmul.f32 %v503_v51, %v820_v45  ;;  %v493_v32 = vmul.f32 %v475_v20, %v836_v57  ;;  %v528_v48 = vmul.f32 %v515_v58, %v805_v35 }
  0x33   : > { %v491_v10 = vsub.f32 %v479_v8, %v489_v36  ;;  %v463_v50 = vadd.f32 %v461_v13, %v435_v61  ;;  %v497_v14 = vmul.f32 %v487_v42, %v808_v37  ;;  %v525_v33 = vmul.f32 %v507_v0, %v846_v12 }
  0x34   : > { %v494_v53 = vadd.f32 %v492_v17, %v466_v63  ;;  %v529_v18 = vmul.f32 %v519_v25, %v823_v47 }
  0x35   : > { %v511_v34 = vadd.f32 %v509_v62, %v491_v10  ;;  %v467_v44 = vadd.f32 %v465_v29, %v463_v50 }
  0x36   : > { %v498_v28 = vadd.f32 %v496_v52, %v494_v53 }
  0x37   : > { %v523_v26 = vsub.f32 %v511_v34, %v521_v22  ;;  %v495_v59 = vadd.f32 %v493_v32, %v467_v44 }
  0x38   : > { %v526_v15 = vadd.f32 %v524_v23, %v498_v28 }
  0x39   : > { %668 = vst [vmem:[%s864_s30 + $0x18] sm:$0xff] %v523_v26  ;;  %v499_v51 = vadd.f32 %v497_v14, %v495_v59 }
  0x3a   : > { %v530_v45 = vadd.f32 %v528_v48, %v526_v15 }
  0x3b   : > { %v527_v56 = vadd.f32 %v525_v33, %v499_v51 }
  0x3c   : > { %669 = vst [vmem:[%s889_s7 + $0x10] sm:$0xff] %v530_v45 }
  0x3d   : > { %v531_v57 = vadd.f32 %v529_v18, %v527_v56 }
  0x3f   : > { %670 = vst [vmem:[%s889_s7 + $0x18] sm:$0xff] %v531_v57 }
  0x40 PF: > { %s15_s15 = sadd.s32 1, %s692_s15  }
  0x41   : > { %p12_p4 = scmp.ge.s32.totalorder %s15_s15, 6  }
  0x43   :  { %14 = sbr.rel (!%p12_p4) target bundleno = 1 (0x1), region = 83 }

// kernel: operator_block_3d_forward.5
= control target key start
LH: loop header
LB: loop body
LE: loop exit
PB: predicated region body
PF: predicated region fallthrough
CT: control target
= control target key end

     0   :  { %s1113_s9 = smov 0   ;;  %s1115_s10 = smov 0   ;;  %s1561_s0 = inlined_call_operand.vmem [shape: f32[2,4,2048], index: 0, kind: input, shape index: {}]   ;;  %s1562_s1 = inlined_call_operand.vmem [shape: f32[8,4], index: 1, kind: input, shape index: {}]   ;;  %s1563_s2 = inlined_call_operand.vmem [shape: f32[2,8,2048], index: 2, kind: output, shape index: {}]  }
   0x1   :  { %s1117_s11 = smov 0  }
   0x2 LB: > { %s24_s12 = sadd.s32 1, %s1088_s10  ;;  %p1028_p0 = scmp.ge.s32.totalorder %s1092_s11, 1  ;;  %s1092_s11 = sphi %s1117_s11, %s12_s11   ;;  %s1088_s10 = sphi %s1115_s10, %s1609_s10   ;;  %s1084_s9 = sphi %s1113_s9, %s1608_s9  }
   0x3   : > { %p26_p1 = scmp.ge.s32.totalorder %s24_s12, 2  ;;  %p133_p2 = scmp.lt.s32.totalorder %s1092_s11, 3 }
   0x5   : > { %s1611_s12 = smov (%p26_p1, %s24_s12), 0  ;;  %p134_p3 = pnand %p1028_p0, %p133_p2 }
   0x7   : > { %137 = sbr.rel (%p134_p3) target bundleno = 179 (0xb3), region = 28 }
   0xe   : > { %v191_v0 = vld [vmem:[%s1562_s1] sm:$0xff]  ;;  %v1094_v1 = vmov 0   ;;  %v1095_v2 = vmov 2   ;;  %v1096_v3 = vmov 1   ;;  %v1097_v4 = vmov 3   ;;  %p164_p4 = scmp.lt.s32.totalorder %s1084_s9, 1 }
   0xf   : > { %1065 = vset.pattern.permute.xlu0 %v1094_v1  ;;  %1067 = vset.pattern.permute.xlu1 %v1095_v2  ;;  %v205_v5 = vlaneseq }
  0x10   : > { %194 = vperm.xlu0 %1065, %v191_v0   ;;  %562 = vperm.xlu1 %1067, %v191_v0   ;;  %s1613_s9 = smov (!%p164_p4, %s1084_s9), 1 }
  0x11   : > { %s1035_s15 = sshll.u32 %s1613_s9, 6  ;;  %v1137_v6 = vshrl.u32 %v205_v5, 7  ;;  %s1036_s19 = sshll.u32 %s1613_s9, 7 }
  0x12   : > { %s171_s18 = scalar_lea.vmem %s1561_s0, %s1035_s15  ;;  %s1530_s22 = scalar_lea.vmem %s1563_s2, %s1036_s19 }
  0x13   : > { %v207_v7 = vsub.s32 0, %v1137_v6  ;;  %v211_v8 = vsub.s32 4, %v1137_v6  ;;  %v1144_v9 = vld [vmem:[%s171_s18] sm:$0xff]  ;;  %v1146_v10 = vld [vmem:[%s171_s18 + $0x8] sm:$0xff]  ;;  %v1148_v11 = vld [vmem:[%s171_s18 + $0x10] sm:$0xff]  ;;  %v1151_v12 = vsub.s32 1, %v1137_v6 }
  0x14   : > { %1066 = vset.pattern.permute.xlu0 %v1096_v3  ;;  %1068 = vset.pattern.permute.xlu1 %v1097_v4  ;;  %v1154_v13 = vsub.s32 5, %v1137_v6  ;;  %v1156_v14 = vld [vmem:[%s171_s18 + $0x18] sm:$0xff]  ;;  %v1158_v15 = vld [vmem:[%s171_s18 + $0x20] sm:$0xff]  ;;  %v1161_v16 = vsub.s32 2, %v1137_v6  ;;  %v1164_v17 = vsub.s32 3, %v1137_v6  ;;  %v1166_v18 = vld [vmem:[%s171_s18 + $0x28] sm:$0xff] }
  0x15   : > { %382 = vperm.xlu0 %1066, %v191_v0   ;;  %742 = vperm.xlu1 %1068, %v191_v0   ;;  %v1168_v19 = vld [vmem:[%s171_s18 + $0x30] sm:$0xff]  ;;  %v208_v20 = vrot.slane %v1144_v9, %v207_v7  ;;  %v212_v21 = vrot.slane %v1144_v9, %v211_v8  ;;  %v1172_v22 = vld [vmem:[%s171_s18 + $0x38] sm:$0xff]  ;;  %v216_v23 = vrot.slane %v1146_v10, %v207_v7  ;;  %v1178_v26 = vsub.s32 6, %v1137_v6 }
  0x16   : > { %v220_v24 = vrot.slane %v1146_v10, %v211_v8  ;;  %v224_v25 = vrot.slane %v1148_v11, %v207_v7  ;;  %v228_v27 = vrot.slane %v1148_v11, %v211_v8  ;;  %v232_v28 = vrot.slane %v1156_v14, %v207_v7 }
  0x17   : > { %v236_v29 = vrot.slane %v1156_v14, %v211_v8  ;;  %v240_v30 = vrot.slane %v1158_v15, %v207_v7  ;;  %v244_v31 = vrot.slane %v1158_v15, %v211_v8  ;;  %v248_v32 = vrot.slane %v1166_v18, %v207_v7 }
  0x18   : > { %v252_v33 = vrot.slane %v1166_v18, %v211_v8  ;;  %v256_v34 = vrot.slane %v1168_v19, %v207_v7  ;;  %v260_v35 = vrot.slane %v1168_v19, %v211_v8  ;;  %v264_v36 = vrot.slane %v1172_v22, %v207_v7 }
  0x19   : > { %1069 = vset.pattern.permute.xlu0 %v1097_v4  ;;  %v268_v37 = vrot.slane %v1172_v22, %v211_v8  ;;  %v1191_v38 = vrot.slane %v208_v20, %v207_v7  ;;  %v1193_v39 = vrot.slane %v212_v21, %v207_v7  ;;  %v1195_v40 = vrot.slane %v216_v23, %v207_v7 }
  0x1a   : > { %v1197_v41 = vrot.slane %v220_v24, %v207_v7  ;;  %v1199_v42 = vrot.slane %v224_v25, %v207_v7  ;;  %v1201_v43 = vrot.slane %v228_v27, %v207_v7  ;;  %v1203_v44 = vrot.slane %v232_v28, %v207_v7 }
  0x1b   : > { %v1205_v45 = vrot.slane %v236_v29, %v207_v7  ;;  %v1207_v46 = vrot.slane %v240_v30, %v207_v7  ;;  %v1209_v47 = vrot.slane %v244_v31, %v207_v7  ;;  %v1211_v48 = vrot.slane %v248_v32, %v207_v7 }
  0x1c   : > { %v1213_v49 = vrot.slane %v252_v33, %v207_v7  ;;  %v1215_v50 = vrot.slane %v256_v34, %v207_v7  ;;  %v1217_v51 = vrot.slane %v260_v35, %v207_v7  ;;  %v1219_v52 = vrot.slane %v264_v36, %v207_v7 }
  0x1d   : > { %v1221_v53 = vrot.slane %v268_v37, %v207_v7  ;;  %v388_v54 = vrot.slane %v1144_v9, %v1151_v12  ;;  %v392_v55 = vrot.slane %v1144_v9, %v1154_v13  ;;  %v396_v56 = vrot.slane %v1146_v10, %v1151_v12 }
  0x1e   : > { %v400_v57 = vrot.slane %v1146_v10, %v1154_v13  ;;  %v404_v58 = vrot.slane %v1148_v11, %v1151_v12  ;;  %v408_v59 = vrot.slane %v1148_v11, %v1154_v13  ;;  %v412_v60 = vrot.slane %v1156_v14, %v1151_v12 }
  0x1f   : > { %v416_v61 = vrot.slane %v1156_v14, %v1154_v13  ;;  %v420_v62 = vrot.slane %v1158_v15, %v1151_v12  ;;  %v424_v63 = vrot.slane %v1158_v15, %v1154_v13  ;;  %v428_v0 = vrot.slane %v1166_v18, %v1151_v12 }
  0x20   : > { %v432_v1 = vrot.slane %v1166_v18, %v1154_v13  ;;  %v436_v2 = vrot.slane %v1168_v19, %v1151_v12  ;;  %v440_v3 = vrot.slane %v1168_v19, %v1154_v13  ;;  %v444_v4 = vrot.slane %v1172_v22, %v1151_v12 }
  0x21   : > { %v448_v5 = vrot.slane %v1172_v22, %v1154_v13  ;;  %v1256_v7 = vrot.slane %v388_v54, %v1151_v12  ;;  %v1259_v8 = vrot.slane %v392_v55, %v1151_v12  ;;  %v1262_v20 = vrot.slane %v396_v56, %v1151_v12 }
  0x22   : > { %v1265_v21 = vrot.slane %v400_v57, %v1151_v12  ;;  %v1268_v23 = vrot.slane %v404_v58, %v1151_v12  ;;  %v1271_v24 = vrot.slane %v408_v59, %v1151_v12  ;;  %v1274_v13 = vrot.slane %v412_v60, %v1151_v12 }
  0x23   : > { %v1277_v25 = vrot.slane %v416_v61, %v1151_v12  ;;  %v1280_v27 = vrot.slane %v420_v62, %v1151_v12  ;;  %v1283_v28 = vrot.slane %v424_v63, %v1151_v12  ;;  %v1286_v29 = vrot.slane %v428_v0, %v1151_v12 }
  0x24   : > { %v1289_v30 = vrot.slane %v432_v1, %v1151_v12  ;;  %v1292_v31 = vrot.slane %v436_v2, %v1151_v12  ;;  %v1295_v32 = vrot.slane %v440_v3, %v1151_v12  ;;  %v1298_v33 = vrot.slane %v444_v4, %v1151_v12 }
  0x25   : > { %v1301_v34 = vrot.slane %v448_v5, %v1151_v12  ;;  %v1304_v35 = vsub.s32 7, %v1137_v6  ;;  %v568_v36 = vrot.slane %v1144_v9, %v1161_v16  ;;  %v572_v37 = vrot.slane %v1144_v9, %v1178_v26 }
  0x26   : > { %1564 = vst [vmem:[#allocation2_spill] sm:$0xff] %v1298_v33  ;;  %v576_v54 = vrot.slane %v1146_v10, %v1161_v16  ;;  %v580_v55 = vrot.slane %v1146_v10, %v1178_v26  ;;  %v584_v56 = vrot.slane %v1148_v11, %v1161_v16  ;;  %v588_v12 = vrot.slane %v1148_v11, %v1178_v26 }
  0x27   : > { %1565 = vst [vmem:[#allocation3_spill] sm:$0xff] %v1301_v34  ;;  %v592_v6 = vrot.slane %v1156_v14, %v1161_v16  ;;  %v596_v57 = vrot.slane %v1156_v14, %v1178_v26  ;;  %v600_v58 = vrot.slane %v1158_v15, %v1161_v16  ;;  %v604_v59 = vrot.slane %v1158_v15, %v1178_v26 }
  0x28   : > { %v608_v60 = vrot.slane %v1166_v18, %v1161_v16  ;;  %v612_v61 = vrot.slane %v1166_v18, %v1178_v26  ;;  %v616_v62 = vrot.slane %v1168_v19, %v1161_v16  ;;  %v620_v63 = vrot.slane %v1168_v19, %v1178_v26 }
  0x29   : > { %v624_v0 = vrot.slane %v1172_v22, %v1161_v16  ;;  %v628_v1 = vrot.slane %v1172_v22, %v1178_v26  ;;  %v1339_v2 = vrot.slane %v568_v36, %v1161_v16  ;;  %v1342_v3 = vrot.slane %v572_v37, %v1161_v16 }
  0x2a   : > { %v1345_v4 = vrot.slane %v576_v54, %v1161_v16  ;;  %v1348_v5 = vrot.slane %v580_v55, %v1161_v16  ;;  %v1351_v34 = vrot.slane %v584_v56, %v1161_v16  ;;  %v1354_v33 = vrot.slane %v588_v12, %v1161_v16 }
  0x2b   : > { %v1357_v26 = vrot.slane %v592_v6, %v1161_v16  ;;  %v1360_v36 = vrot.slane %v596_v57, %v1161_v16  ;;  %v1363_v37 = vrot.slane %v600_v58, %v1161_v16  ;;  %v1366_v54 = vrot.slane %v604_v59, %v1161_v16 }
  0x2c   : > { %v1369_v55 = vrot.slane %v608_v60, %v1161_v16  ;;  %v1372_v56 = vrot.slane %v612_v61, %v1161_v16  ;;  %v1375_v12 = vrot.slane %v616_v62, %v1161_v16  ;;  %v1378_v6 = vrot.slane %v620_v63, %v1161_v16 }
  0x2d   : > { %1566 = vst [vmem:[#allocation4_spill] sm:$0xff] %v1366_v54  ;;  %v1381_v57 = vrot.slane %v624_v0, %v1161_v16  ;;  %v1384_v58 = vrot.slane %v628_v1, %v1161_v16  ;;  %v748_v59 = vrot.slane %v1144_v9, %v1164_v17  ;;  %v752_v60 = vrot.slane %v1144_v9, %v1304_v35 }
  0x2e   : > { %1567 = vst [vmem:[#allocation5_spill] sm:$0xff] %v1369_v55  ;;  %1568 = vst [vmem:[#allocation6_spill] sm:$0xff] %v1372_v56  ;;  %v756_v61 = vrot.slane %v1146_v10, %v1164_v17  ;;  %v760_v62 = vrot.slane %v1146_v10, %v1304_v35  ;;  %v764_v63 = vrot.slane %v1148_v11, %v1164_v17 }
  0x2f   : > { %1569 = vst [vmem:[#allocation7_spill] sm:$0xff] %v1375_v12  ;;  %1570 = vst [vmem:[#allocation8_spill] sm:$0xff] %v1378_v6  ;;  %v768_v0 = vrot.slane %v1148_v11, %v1304_v35  ;;  %v772_v16 = vrot.slane %v1156_v14, %v1164_v17  ;;  %v776_v1 = vrot.slane %v1156_v14, %v1304_v35 }
  0x30   : > { %1571 = vst [vmem:[#allocation9_spill] sm:$0xff] %v1381_v57  ;;  %1572 = vst [vmem:[#allocation10_spill] sm:$0xff] %v1384_v58  ;;  %v780_v9 = vrot.slane %v1158_v15, %v1164_v17  ;;  %v784_v58 = vrot.slane %v1158_v15, %v1304_v35  ;;  %v788_v10 = vrot.slane %v1166_v18, %v1164_v17 }
  0x31   : > { %v792_v57 = vrot.slane %v1166_v18, %v1304_v35  ;;  %v796_v11 = vrot.slane %v1168_v19, %v1164_v17  ;;  %v800_v6 = vrot.slane %v1168_v19, %v1304_v35  ;;  %v804_v14 = vrot.slane %v1172_v22, %v1164_v17 }
  0x32   : > { %v808_v12 = vrot.slane %v1172_v22, %v1304_v35  ;;  %v1419_v15 = vrot.slane %v748_v59, %v1164_v17  ;;  %v1422_v56 = vrot.slane %v752_v60, %v1164_v17  ;;  %v1425_v18 = vrot.slane %v756_v61, %v1164_v17 }
  0x33   : > { %v1428_v55 = vrot.slane %v760_v62, %v1164_v17  ;;  %v1431_v19 = vrot.slane %v764_v63, %v1164_v17  ;;  %v1434_v54 = vrot.slane %v768_v0, %v1164_v17  ;;  %v1437_v22 = vrot.slane %v772_v16, %v1164_v17 }
  0x34   : > { %v1440_v35 = vrot.slane %v776_v1, %v1164_v17  ;;  %v1443_v59 = vrot.slane %v780_v9, %v1164_v17  ;;  %v1446_v60 = vrot.slane %v784_v58, %v1164_v17  ;;  %v1449_v61 = vrot.slane %v788_v10, %v1164_v17 }
  0x35   : > { %1573 = vst [vmem:[#allocation11_spill] sm:$0xff] %v1428_v55  ;;  %1574 = vst [vmem:[#allocation12_spill] sm:$0xff] %v1431_v19  ;;  %v1452_v62 = vrot.slane %v792_v57, %v1164_v17  ;;  %v1455_v0 = vrot.slane %v796_v11, %v1164_v17  ;;  %v1458_v16 = vrot.slane %v800_v6, %v1164_v17 }
  0x36   : > { %1575 = vst [vmem:[#allocation13_spill] sm:$0xff] %v1434_v54  ;;  %1576 = vst [vmem:[#allocation14_spill] sm:$0xff] %v1437_v22  ;;  %v1461_v1 = vrot.slane %v804_v14, %v1164_v17  ;;  %v1464_v9 = vrot.slane %v808_v12, %v1164_v17 }
  0x37   : > { %1577 = vst [vmem:[#allocation15_spill] sm:$0xff] %v1440_v35  ;;  %1578 = vst [vmem:[#allocation16_spill] sm:$0xff] %v1443_v59 }
  0x38   : > { %1579 = vst [vmem:[#allocation17_spill] sm:$0xff] %v1446_v60  ;;  %1580 = vst [vmem:[#allocation18_spill] sm:$0xff] %v1449_v61 }
  0x39   : > { %1581 = vst [vmem:[#allocation19_spill] sm:$0xff] %v1452_v62  ;;  %1582 = vst [vmem:[#allocation20_spill] sm:$0xff] %v1455_v0 }
  0x3a   : > { %1583 = vst [vmem:[#allocation21_spill] sm:$0xff] %v1458_v16  ;;  %1584 = vst [vmem:[#allocation22_spill] sm:$0xff] %v1461_v1  ;;  %v1587_v1 = vld [vmem:[#allocation3_spill] sm:$0xff] }
  0x3b   : > { %1585 = vst [vmem:[#allocation23_spill] sm:$0xff] %v1464_v9 }
  0x8f   : > { %v195_v63 = vpop.permute.xlu0 %194  ;;  %v563_v61 = vpop.permute.xlu1 %562 }
  0x90   : > { %v349_v58 = vmul.f32 %v1191_v38, %v195_v63  ;;  %v350_v10 = vmul.f32 %v1193_v39, %v195_v63  ;;  %v351_v57 = vmul.f32 %v1195_v40, %v195_v63  ;;  %v352_v62 = vmul.f32 %v1197_v41, %v195_v63 }
  0x91   : > { %v353_v11 = vmul.f32 %v1199_v42, %v195_v63  ;;  %v354_v6 = vmul.f32 %v1201_v43, %v195_v63  ;;  %v355_v16 = vmul.f32 %v1203_v44, %v195_v63  ;;  %v356_v14 = vmul.f32 %v1205_v45, %v195_v63 }
  0x92   : > { %v357_v17 = vmul.f32 %v1207_v46, %v195_v63  ;;  %v358_v12 = vmul.f32 %v1209_v47, %v195_v63  ;;  %v359_v38 = vmul.f32 %v1211_v48, %v195_v63  ;;  %v360_v39 = vmul.f32 %v1213_v49, %v195_v63 }
  0x93   : > { %v361_v40 = vmul.f32 %v1215_v50, %v195_v63  ;;  %v362_v41 = vmul.f32 %v1217_v51, %v195_v63  ;;  %v363_v42 = vmul.f32 %v1219_v52, %v195_v63  ;;  %v364_v43 = vmul.f32 %v1221_v53, %v195_v63  ;;  %v1586_v63 = vld [vmem:[#allocation2_spill] sm:$0xff] }
  0x94   : > { %v383_v9 = vpop.permute.xlu0 %382  ;;  %v709_v44 = vmul.f32 %v1339_v2, %v563_v61  ;;  %v710_v45 = vmul.f32 %v1342_v3, %v563_v61  ;;  %v711_v46 = vmul.f32 %v1345_v4, %v563_v61  ;;  %v712_v47 = vmul.f32 %v1348_v5, %v563_v61 }
  0x95   : > { %v529_v48 = vmul.f32 %v1256_v7, %v383_v9  ;;  %v530_v49 = vmul.f32 %v1259_v8, %v383_v9  ;;  %v531_v50 = vmul.f32 %v1262_v20, %v383_v9  ;;  %v532_v51 = vmul.f32 %v1265_v21, %v383_v9 }
  0x96   : > { %v533_v52 = vmul.f32 %v1268_v23, %v383_v9  ;;  %v534_v53 = vmul.f32 %v1271_v24, %v383_v9  ;;  %v535_v2 = vmul.f32 %v1274_v13, %v383_v9  ;;  %v536_v3 = vmul.f32 %v1277_v25, %v383_v9 }
  0x97   : > { %v537_v4 = vmul.f32 %v1280_v27, %v383_v9  ;;  %v538_v5 = vmul.f32 %v1283_v28, %v383_v9  ;;  %v539_v7 = vmul.f32 %v1286_v29, %v383_v9  ;;  %v540_v8 = vmul.f32 %v1289_v30, %v383_v9 }
  0x98   : > { %v541_v20 = vmul.f32 %v1292_v31, %v383_v9  ;;  %v542_v21 = vmul.f32 %v1295_v32, %v383_v9  ;;  %v543_v23 = vmul.f32 %v1586_v63, %v383_v9  ;;  %v544_v24 = vmul.f32 %v1587_v1, %v383_v9 }
  0x99   : > { %v545_v0 = vadd.f32 %v529_v48, %v349_v58  ;;  %v546_v13 = vadd.f32 %v530_v49, %v350_v10  ;;  %v547_v60 = vadd.f32 %v531_v50, %v351_v57  ;;  %v548_v25 = vadd.f32 %v532_v51, %v352_v62  ;;  %v1589_v57 = vld [vmem:[#allocation5_spill] sm:$0xff] }
  0x9a   : > { %v549_v59 = vadd.f32 %v533_v52, %v353_v11  ;;  %v550_v27 = vadd.f32 %v534_v53, %v354_v6  ;;  %v551_v35 = vadd.f32 %v535_v2, %v355_v16  ;;  %v552_v28 = vadd.f32 %v536_v3, %v356_v14  ;;  %v1588_v16 = vld [vmem:[#allocation4_spill] sm:$0xff]  ;;  %v1590_v6 = vld [vmem:[#allocation6_spill] sm:$0xff] }
  0x9b   : > { %v553_v22 = vadd.f32 %v537_v4, %v357_v17  ;;  %v554_v29 = vadd.f32 %v538_v5, %v358_v12  ;;  %v555_v54 = vadd.f32 %v539_v7, %v359_v38  ;;  %v556_v30 = vadd.f32 %v540_v8, %v360_v39  ;;  %v1591_v17 = vld [vmem:[#allocation7_spill] sm:$0xff]  ;;  %v1592_v38 = vld [vmem:[#allocation8_spill] sm:$0xff] }
  0x9c   : > { %v557_v19 = vadd.f32 %v541_v20, %v361_v40  ;;  %v558_v31 = vadd.f32 %v542_v21, %v362_v41  ;;  %v559_v55 = vadd.f32 %v543_v23, %v363_v42  ;;  %v560_v32 = vadd.f32 %v544_v24, %v364_v43  ;;  %v1593_v40 = vld [vmem:[#allocation9_spill] sm:$0xff]  ;;  %v1594_v41 = vld [vmem:[#allocation10_spill] sm:$0xff]  ;;  %v1599_v20 = vld [vmem:[#allocation15_spill] sm:$0xff] }
  0x9d   : > { %v713_v63 = vmul.f32 %v1351_v34, %v563_v61  ;;  %v714_v1 = vmul.f32 %v1354_v33, %v563_v61  ;;  %v715_v9 = vmul.f32 %v1357_v26, %v563_v61  ;;  %v716_v62 = vmul.f32 %v1360_v36, %v563_v61  ;;  %v1600_v21 = vld [vmem:[#allocation16_spill] sm:$0xff]  ;;  %v1601_v23 = vld [vmem:[#allocation17_spill] sm:$0xff] }
  0x9e   : > { %v717_v58 = vmul.f32 %v1363_v37, %v563_v61  ;;  %v718_v10 = vmul.f32 %v1588_v16, %v563_v61  ;;  %v719_v11 = vmul.f32 %v1589_v57, %v563_v61  ;;  %v720_v14 = vmul.f32 %v1590_v6, %v563_v61  ;;  %v743_v37 = vpop.permute.xlu1 %742 }
  0x9f   : > { %v721_v12 = vmul.f32 %v1591_v17, %v563_v61  ;;  %v722_v39 = vmul.f32 %v1592_v38, %v563_v61  ;;  %v723_v34 = vmul.f32 %v1593_v40, %v563_v61  ;;  %v724_v33 = vmul.f32 %v1594_v41, %v563_v61 }
  0xa0   : > { %v725_v42 = vadd.f32 %v709_v44, %v545_v0  ;;  %v726_v26 = vadd.f32 %v710_v45, %v546_v13  ;;  %v727_v36 = vadd.f32 %v711_v46, %v547_v60  ;;  %v728_v43 = vadd.f32 %v712_v47, %v548_v25  ;;  %v1595_v44 = vld [vmem:[#allocation11_spill] sm:$0xff]  ;;  %v1596_v45 = vld [vmem:[#allocation12_spill] sm:$0xff]  ;;  %v1597_v46 = vld [vmem:[#allocation13_spill] sm:$0xff] }
  0xa1   : > { %v729_v48 = vadd.f32 %v713_v63, %v549_v59  ;;  %v730_v49 = vadd.f32 %v714_v1, %v550_v27  ;;  %v731_v50 = vadd.f32 %v715_v9, %v551_v35  ;;  %v732_v51 = vadd.f32 %v716_v62, %v552_v28  ;;  %v1598_v47 = vld [vmem:[#allocation14_spill] sm:$0xff]  ;;  %v1603_v25 = vld [vmem:[#allocation19_spill] sm:$0xff]  ;;  %v1605_v28 = vld [vmem:[#allocation21_spill] sm:$0xff] }
  0xa2   : > { %v733_v52 = vadd.f32 %v717_v58, %v553_v22  ;;  %v734_v53 = vadd.f32 %v718_v10, %v554_v29  ;;  %v735_v2 = vadd.f32 %v719_v11, %v555_v54  ;;  %v736_v3 = vadd.f32 %v720_v14, %v556_v30  ;;  %v1602_v13 = vld [vmem:[#allocation18_spill] sm:$0xff] }
  0xa3   : > { %v737_v4 = vadd.f32 %v721_v12, %v557_v19  ;;  %v738_v5 = vadd.f32 %v722_v39, %v558_v31  ;;  %v739_v7 = vadd.f32 %v723_v34, %v559_v55  ;;  %v740_v8 = vadd.f32 %v724_v33, %v560_v32  ;;  %v1606_v30 = vld [vmem:[#allocation22_spill] sm:$0xff]  ;;  %v1607_v32 = vld [vmem:[#allocation23_spill] sm:$0xff] }
  0xa4   : > { %v889_v61 = vmul.f32 %v1419_v15, %v743_v37  ;;  %v890_v0 = vmul.f32 %v1422_v56, %v743_v37  ;;  %v891_v60 = vmul.f32 %v1425_v18, %v743_v37  ;;  %v892_v59 = vmul.f32 %v1595_v44, %v743_v37  ;;  %v1604_v18 = vld [vmem:[#allocation20_spill] sm:$0xff] }
  0xa5   : > { %v893_v35 = vmul.f32 %v1596_v45, %v743_v37  ;;  %v894_v22 = vmul.f32 %v1597_v46, %v743_v37  ;;  %v895_v54 = vmul.f32 %v1598_v47, %v743_v37  ;;  %v896_v19 = vmul.f32 %v1599_v20, %v743_v37 }
  0xa6   : > { %v897_v55 = vmul.f32 %v1600_v21, %v743_v37  ;;  %v898_v24 = vmul.f32 %v1601_v23, %v743_v37  ;;  %v899_v15 = vmul.f32 %v1602_v13, %v743_v37  ;;  %v900_v56 = vmul.f32 %v1603_v25, %v743_v37 }
  0xa7   : > { %v901_v27 = vmul.f32 %v1604_v18, %v743_v37  ;;  %v902_v29 = vmul.f32 %v1605_v28, %v743_v37  ;;  %v903_v31 = vmul.f32 %v1606_v30, %v743_v37  ;;  %v904_v63 = vmul.f32 %v1607_v32, %v743_v37 }
  0xa8   : > { %v905_v1 = vadd.f32 %v889_v61, %v725_v42  ;;  %v906_v9 = vadd.f32 %v890_v0, %v726_v26  ;;  %v907_v62 = vadd.f32 %v891_v60, %v727_v36  ;;  %v908_v58 = vadd.f32 %v892_v59, %v728_v43 }
  0xa9   : > { %v909_v16 = vadd.f32 %v893_v35, %v729_v48  ;;  %v910_v10 = vadd.f32 %v894_v22, %v730_v49  ;;  %v911_v57 = vadd.f32 %v895_v54, %v731_v50  ;;  %v912_v11 = vadd.f32 %v896_v19, %v732_v51 }
  0xaa   : > { %v913_v6 = vadd.f32 %v897_v55, %v733_v52  ;;  %v914_v14 = vadd.f32 %v898_v24, %v734_v53  ;;  %v915_v17 = vadd.f32 %v899_v15, %v735_v2  ;;  %v916_v12 = vadd.f32 %v900_v56, %v736_v3  ;;  %921 = vst [vmem:[%s1530_s22] sm:$0xff] %v905_v1 }
  0xab   : > { %922 = vst [vmem:[%s1530_s22 + $0x8] sm:$0xff] %v906_v9  ;;  %923 = vst [vmem:[%s1530_s22 + $0x10] sm:$0xff] %v907_v62  ;;  %v917_v38 = vadd.f32 %v901_v27, %v737_v4  ;;  %v918_v39 = vadd.f32 %v902_v29, %v738_v5  ;;  %v919_v40 = vadd.f32 %v903_v31, %v739_v7 }
  0xac   : > { %924 = vst [vmem:[%s1530_s22 + $0x18] sm:$0xff] %v908_v58  ;;  %v920_v34 = vadd.f32 %v904_v63, %v740_v8  ;;  %925 = vst [vmem:[%s1530_s22 + $0x20] sm:$0xff] %v909_v16 }
  0xad   : > { %926 = vst [vmem:[%s1530_s22 + $0x28] sm:$0xff] %v910_v10  ;;  %927 = vst [vmem:[%s1530_s22 + $0x30] sm:$0xff] %v911_v57 }
  0xae   : > { %928 = vst [vmem:[%s1530_s22 + $0x38] sm:$0xff] %v912_v11  ;;  %929 = vst [vmem:[%s1530_s22 + $0x40] sm:$0xff] %v913_v6 }
  0xaf   : > { %930 = vst [vmem:[%s1530_s22 + $0x48] sm:$0xff] %v914_v14  ;;  %931 = vst [vmem:[%s1530_s22 + $0x50] sm:$0xff] %v915_v17 }
  0xb0   : > { %932 = vst [vmem:[%s1530_s22 + $0x58] sm:$0xff] %v916_v12  ;;  %933 = vst [vmem:[%s1530_s22 + $0x60] sm:$0xff] %v917_v38 }
  0xb1   : > { %934 = vst [vmem:[%s1530_s22 + $0x68] sm:$0xff] %v918_v39  ;;  %935 = vst [vmem:[%s1530_s22 + $0x70] sm:$0xff] %v919_v40 }
  0xb2   : > { %936 = vst [vmem:[%s1530_s22 + $0x78] sm:$0xff] %v920_v34 }
  0xb3 PF: > { %s12_s11 = sadd.s32 1, %s1092_s11   ;;  %s1608_s9 = smov %s1088_s10 }
  0xb4   : > { %p9_p5 = scmp.ge.s32.totalorder %s12_s11, 4   ;;  %s1609_s10 = smov %s1611_s12 }
  0xb6   :  { %11 = sbr.rel (!%p9_p5) target bundleno = 2 (0x2), region = 58 }

// kernel: reverse.1
= control target key start
LH: loop header
LB: loop body
LE: loop exit
PB: predicated region body
PF: predicated region fallthrough
CT: control target
= control target key end

     0   :  { %s1160_s0 = inlined_call_operand.vmem [shape: f32[2,8,16,16,3], index: 0, kind: input, shape index: {}]   ;;  %s1161_s1 = inlined_call_operand.vmem [shape: f32[2,8,16,16,3], index: 1, kind: output, shape index: {}]  }
   0x1   :  { %v384_v0 = vld [vmem:[%s1160_s0 + $0x20] sm:$0xff]  ;;  %v387_v2 = vld [vmem:[%s1160_s0 + $0x50] sm:$0xff]  ;;  %v478_v48 = vld [vmem:[%s1160_s0 + $0x28] sm:$0xff] }
   0x2   :  { %v385_v1 = vld [vmem:[%s1160_s0 + $0x1a0] sm:$0xff]  ;;  %4 = vst [vmem:[%s1161_s1] sm:$0xff] %v384_v0  ;;  %388 = vst [vmem:[%s1161_s1 + $0x30] sm:$0xff] %v387_v2  ;;  %v389_v3 = vld [vmem:[%s1160_s0 + $0x1d0] sm:$0xff] }
   0x3   :  { %386 = vst [vmem:[%s1161_s1 + $0x180] sm:$0xff] %v385_v1  ;;  %v391_v4 = vld [vmem:[%s1160_s0 + $0x80] sm:$0xff]  ;;  %390 = vst [vmem:[%s1161_s1 + $0x1b0] sm:$0xff] %v389_v3  ;;  %v395_v6 = vld [vmem:[%s1160_s0 + $0xb0] sm:$0xff] }
   0x4   :  { %v393_v5 = vld [vmem:[%s1160_s0 + $0x200] sm:$0xff]  ;;  %392 = vst [vmem:[%s1161_s1 + $0x60] sm:$0xff] %v391_v4  ;;  %v397_v7 = vld [vmem:[%s1160_s0 + $0x230] sm:$0xff]  ;;  %396 = vst [vmem:[%s1161_s1 + $0x90] sm:$0xff] %v395_v6 }
   0x5   :  { %394 = vst [vmem:[%s1161_s1 + $0x1e0] sm:$0xff] %v393_v5  ;;  %v399_v8 = vld [vmem:[%s1160_s0 + $0xe0] sm:$0xff]  ;;  %398 = vst [vmem:[%s1161_s1 + $0x210] sm:$0xff] %v397_v7  ;;  %v403_v10 = vld [vmem:[%s1160_s0 + $0x110] sm:$0xff] }
   0x6   :  { %400 = vst [vmem:[%s1161_s1 + $0xc0] sm:$0xff] %v399_v8  ;;  %v401_v9 = vld [vmem:[%s1160_s0 + $0x260] sm:$0xff]  ;;  %v405_v11 = vld [vmem:[%s1160_s0 + $0x290] sm:$0xff]  ;;  %404 = vst [vmem:[%s1161_s1 + $0xf0] sm:$0xff] %v403_v10 }
   0x7   :  { %402 = vst [vmem:[%s1161_s1 + $0x240] sm:$0xff] %v401_v9  ;;  %406 = vst [vmem:[%s1161_s1 + $0x270] sm:$0xff] %v405_v11  ;;  %v407_v12 = vld [vmem:[%s1160_s0 + $0x140] sm:$0xff]  ;;  %v411_v14 = vld [vmem:[%s1160_s0 + $0x170] sm:$0xff] }
   0x8   :  { %v409_v13 = vld [vmem:[%s1160_s0 + $0x2c0] sm:$0xff]  ;;  %408 = vst [vmem:[%s1161_s1 + $0x120] sm:$0xff] %v407_v12  ;;  %412 = vst [vmem:[%s1161_s1 + $0x150] sm:$0xff] %v411_v14  ;;  %v413_v15 = vld [vmem:[%s1160_s0 + $0x2f0] sm:$0xff] }
   0x9   :  { %410 = vst [vmem:[%s1161_s1 + $0x2a0] sm:$0xff] %v409_v13  ;;  %v415_v16 = vld [vmem:[%s1160_s0 + $0x10] sm:$0xff]  ;;  %414 = vst [vmem:[%s1161_s1 + $0x2d0] sm:$0xff] %v413_v15  ;;  %v419_v18 = vld [vmem:[%s1160_s0 + $0x40] sm:$0xff] }
   0xa   :  { %v417_v17 = vld [vmem:[%s1160_s0 + $0x190] sm:$0xff]  ;;  %416 = vst [vmem:[%s1161_s1 + $0x10] sm:$0xff] %v415_v16  ;;  %v421_v19 = vld [vmem:[%s1160_s0 + $0x1c0] sm:$0xff]  ;;  %420 = vst [vmem:[%s1161_s1 + $0x40] sm:$0xff] %v419_v18 }
   0xb   :  { %418 = vst [vmem:[%s1161_s1 + $0x190] sm:$0xff] %v417_v17  ;;  %v423_v20 = vld [vmem:[%s1160_s0 + $0x70] sm:$0xff]  ;;  %422 = vst [vmem:[%s1161_s1 + $0x1c0] sm:$0xff] %v421_v19  ;;  %v427_v22 = vld [vmem:[%s1160_s0 + $0xa0] sm:$0xff] }
   0xc   :  { %424 = vst [vmem:[%s1161_s1 + $0x70] sm:$0xff] %v423_v20  ;;  %v425_v21 = vld [vmem:[%s1160_s0 + $0x1f0] sm:$0xff]  ;;  %v429_v23 = vld [vmem:[%s1160_s0 + $0x220] sm:$0xff]  ;;  %428 = vst [vmem:[%s1161_s1 + $0xa0] sm:$0xff] %v427_v22 }
   0xd   :  { %426 = vst [vmem:[%s1161_s1 + $0x1f0] sm:$0xff] %v425_v21  ;;  %430 = vst [vmem:[%s1161_s1 + $0x220] sm:$0xff] %v429_v23  ;;  %v431_v24 = vld [vmem:[%s1160_s0 + $0xd0] sm:$0xff]  ;;  %v435_v26 = vld [vmem:[%s1160_s0 + $0x100] sm:$0xff] }
   0xe   :  { %v433_v25 = vld [vmem:[%s1160_s0 + $0x250] sm:$0xff]  ;;  %432 = vst [vmem:[%s1161_s1 + $0xd0] sm:$0xff] %v431_v24  ;;  %436 = vst [vmem:[%s1161_s1 + $0x100] sm:$0xff] %v435_v26  ;;  %v437_v27 = vld [vmem:[%s1160_s0 + $0x280] sm:$0xff] }
   0xf   :  { %434 = vst [vmem:[%s1161_s1 + $0x250] sm:$0xff] %v433_v25  ;;  %v439_v28 = vld [vmem:[%s1160_s0 + $0x130] sm:$0xff]  ;;  %438 = vst [vmem:[%s1161_s1 + $0x280] sm:$0xff] %v437_v27  ;;  %v443_v30 = vld [vmem:[%s1160_s0 + $0x160] sm:$0xff] }
  0x10   :  { %v441_v29 = vld [vmem:[%s1160_s0 + $0x2b0] sm:$0xff]  ;;  %440 = vst [vmem:[%s1161_s1 + $0x130] sm:$0xff] %v439_v28  ;;  %v445_v31 = vld [vmem:[%s1160_s0 + $0x2e0] sm:$0xff]  ;;  %444 = vst [vmem:[%s1161_s1 + $0x160] sm:$0xff] %v443_v30 }
  0x11   :  { %442 = vst [vmem:[%s1161_s1 + $0x2b0] sm:$0xff] %v441_v29  ;;  %v129_v32 = vld [vmem:[%s1160_s0] sm:$0xff]  ;;  %446 = vst [vmem:[%s1161_s1 + $0x2e0] sm:$0xff] %v445_v31  ;;  %v450_v34 = vld [vmem:[%s1160_s0 + $0x30] sm:$0xff] }
  0x12   :  { %447 = vst [vmem:[%s1161_s1 + $0x20] sm:$0xff] %v129_v32  ;;  %v448_v33 = vld [vmem:[%s1160_s0 + $0x180] sm:$0xff]  ;;  %v452_v35 = vld [vmem:[%s1160_s0 + $0x1b0] sm:$0xff]  ;;  %451 = vst [vmem:[%s1161_s1 + $0x50] sm:$0xff] %v450_v34 }
  0x13   :  { %449 = vst [vmem:[%s1161_s1 + $0x1a0] sm:$0xff] %v448_v33  ;;  %453 = vst [vmem:[%s1161_s1 + $0x1d0] sm:$0xff] %v452_v35  ;;  %v454_v36 = vld [vmem:[%s1160_s0 + $0x60] sm:$0xff]  ;;  %v458_v38 = vld [vmem:[%s1160_s0 + $0x90] sm:$0xff] }
  0x14   :  { %v456_v37 = vld [vmem:[%s1160_s0 + $0x1e0] sm:$0xff]  ;;  %455 = vst [vmem:[%s1161_s1 + $0x80] sm:$0xff] %v454_v36  ;;  %459 = vst [vmem:[%s1161_s1 + $0xb0] sm:$0xff] %v458_v38  ;;  %v460_v39 = vld [vmem:[%s1160_s0 + $0x210] sm:$0xff] }
  0x15   :  { %457 = vst [vmem:[%s1161_s1 + $0x200] sm:$0xff] %v456_v37  ;;  %v462_v40 = vld [vmem:[%s1160_s0 + $0xc0] sm:$0xff]  ;;  %461 = vst [vmem:[%s1161_s1 + $0x230] sm:$0xff] %v460_v39  ;;  %v466_v42 = vld [vmem:[%s1160_s0 + $0xf0] sm:$0xff] }
  0x16   :  { %v464_v41 = vld [vmem:[%s1160_s0 + $0x240] sm:$0xff]  ;;  %463 = vst [vmem:[%s1161_s1 + $0xe0] sm:$0xff] %v462_v40  ;;  %v468_v43 = vld [vmem:[%s1160_s0 + $0x270] sm:$0xff]  ;;  %467 = vst [vmem:[%s1161_s1 + $0x110] sm:$0xff] %v466_v42 }
  0x17   :  { %465 = vst [vmem:[%s1161_s1 + $0x260] sm:$0xff] %v464_v41  ;;  %v470_v44 = vld [vmem:[%s1160_s0 + $0x120] sm:$0xff]  ;;  %469 = vst [vmem:[%s1161_s1 + $0x290] sm:$0xff] %v468_v43  ;;  %v474_v46 = vld [vmem:[%s1160_s0 + $0x150] sm:$0xff] }
  0x18   :  { %471 = vst [vmem:[%s1161_s1 + $0x140] sm:$0xff] %v470_v44  ;;  %v472_v45 = vld [vmem:[%s1160_s0 + $0x2a0] sm:$0xff]  ;;  %v476_v47 = vld [vmem:[%s1160_s0 + $0x2d0] sm:$0xff]  ;;  %475 = vst [vmem:[%s1161_s1 + $0x170] sm:$0xff] %v474_v46 }
  0x19   :  { %473 = vst [vmem:[%s1161_s1 + $0x2c0] sm:$0xff] %v472_v45  ;;  %477 = vst [vmem:[%s1161_s1 + $0x2f0] sm:$0xff] %v476_v47  ;;  %v480_v49 = vld [vmem:[%s1160_s0 + $0x1a8] sm:$0xff]  ;;  %v482_v50 = vld [vmem:[%s1160_s0 + $0x58] sm:$0xff] }
  0x1a   :  { %479 = vst [vmem:[%s1161_s1 + $0x8] sm:$0xff] %v478_v48  ;;  %481 = vst [vmem:[%s1161_s1 + $0x188] sm:$0xff] %v480_v49  ;;  %v484_v51 = vld [vmem:[%s1160_s0 + $0x1d8] sm:$0xff]  ;;  %v486_v52 = vld [vmem:[%s1160_s0 + $0x88] sm:$0xff] }
  0x1b   :  { %483 = vst [vmem:[%s1161_s1 + $0x38] sm:$0xff] %v482_v50  ;;  %v488_v53 = vld [vmem:[%s1160_s0 + $0x208] sm:$0xff]  ;;  %485 = vst [vmem:[%s1161_s1 + $0x1b8] sm:$0xff] %v484_v51  ;;  %v490_v54 = vld [vmem:[%s1160_s0 + $0xb8] sm:$0xff] }
  0x1c   :  { %487 = vst [vmem:[%s1161_s1 + $0x68] sm:$0xff] %v486_v52  ;;  %489 = vst [vmem:[%s1161_s1 + $0x1e8] sm:$0xff] %v488_v53  ;;  %v492_v55 = vld [vmem:[%s1160_s0 + $0x238] sm:$0xff]  ;;  %v494_v56 = vld [vmem:[%s1160_s0 + $0xe8] sm:$0xff] }
  0x1d   :  { %491 = vst [vmem:[%s1161_s1 + $0x98] sm:$0xff] %v490_v54  ;;  %493 = vst [vmem:[%s1161_s1 + $0x218] sm:$0xff] %v492_v55  ;;  %v496_v57 = vld [vmem:[%s1160_s0 + $0x268] sm:$0xff]  ;;  %v498_v58 = vld [vmem:[%s1160_s0 + $0x118] sm:$0xff] }
  0x1e   :  { %495 = vst [vmem:[%s1161_s1 + $0xc8] sm:$0xff] %v494_v56  ;;  %v500_v59 = vld [vmem:[%s1160_s0 + $0x298] sm:$0xff]  ;;  %497 = vst [vmem:[%s1161_s1 + $0x248] sm:$0xff] %v496_v57  ;;  %v502_v60 = vld [vmem:[%s1160_s0 + $0x148] sm:$0xff] }
  0x1f   :  { %499 = vst [vmem:[%s1161_s1 + $0xf8] sm:$0xff] %v498_v58  ;;  %501 = vst [vmem:[%s1161_s1 + $0x278] sm:$0xff] %v500_v59  ;;  %v504_v61 = vld [vmem:[%s1160_s0 + $0x2c8] sm:$0xff]  ;;  %v506_v62 = vld [vmem:[%s1160_s0 + $0x178] sm:$0xff] }
  0x20   :  { %503 = vst [vmem:[%s1161_s1 + $0x128] sm:$0xff] %v502_v60  ;;  %505 = vst [vmem:[%s1161_s1 + $0x2a8] sm:$0xff] %v504_v61  ;;  %v508_v63 = vld [vmem:[%s1160_s0 + $0x2f8] sm:$0xff]  ;;  %v514_v2 = vld [vmem:[%s1160_s0 + $0x48] sm:$0xff] }
  0x21   :  { %507 = vst [vmem:[%s1161_s1 + $0x158] sm:$0xff] %v506_v62  ;;  %v510_v0 = vld [vmem:[%s1160_s0 + $0x18] sm:$0xff]  ;;  %509 = vst [vmem:[%s1161_s1 + $0x2d8] sm:$0xff] %v508_v63  ;;  %v516_v3 = vld [vmem:[%s1160_s0 + $0x1c8] sm:$0xff] }
  0x22   :  { %v512_v1 = vld [vmem:[%s1160_s0 + $0x198] sm:$0xff]  ;;  %511 = vst [vmem:[%s1161_s1 + $0x18] sm:$0xff] %v510_v0  ;;  %515 = vst [vmem:[%s1161_s1 + $0x48] sm:$0xff] %v514_v2  ;;  %v522_v6 = vld [vmem:[%s1160_s0 + $0xa8] sm:$0xff] }
  0x23   :  { %513 = vst [vmem:[%s1161_s1 + $0x198] sm:$0xff] %v512_v1  ;;  %v518_v4 = vld [vmem:[%s1160_s0 + $0x78] sm:$0xff]  ;;  %517 = vst [vmem:[%s1161_s1 + $0x1c8] sm:$0xff] %v516_v3  ;;  %v524_v7 = vld [vmem:[%s1160_s0 + $0x228] sm:$0xff] }
  0x24   :  { %519 = vst [vmem:[%s1161_s1 + $0x78] sm:$0xff] %v518_v4  ;;  %v520_v5 = vld [vmem:[%s1160_s0 + $0x1f8] sm:$0xff]  ;;  %523 = vst [vmem:[%s1161_s1 + $0xa8] sm:$0xff] %v522_v6  ;;  %v530_v10 = vld [vmem:[%s1160_s0 + $0x108] sm:$0xff] }
  0x25   :  { %521 = vst [vmem:[%s1161_s1 + $0x1f8] sm:$0xff] %v520_v5  ;;  %525 = vst [vmem:[%s1161_s1 + $0x228] sm:$0xff] %v524_v7  ;;  %v526_v8 = vld [vmem:[%s1160_s0 + $0xd8] sm:$0xff]  ;;  %v532_v11 = vld [vmem:[%s1160_s0 + $0x288] sm:$0xff] }
  0x26   :  { %v528_v9 = vld [vmem:[%s1160_s0 + $0x258] sm:$0xff]  ;;  %527 = vst [vmem:[%s1161_s1 + $0xd8] sm:$0xff] %v526_v8  ;;  %531 = vst [vmem:[%s1161_s1 + $0x108] sm:$0xff] %v530_v10  ;;  %v538_v14 = vld [vmem:[%s1160_s0 + $0x168] sm:$0xff] }
  0x27   :  { %529 = vst [vmem:[%s1161_s1 + $0x258] sm:$0xff] %v528_v9  ;;  %v534_v12 = vld [vmem:[%s1160_s0 + $0x138] sm:$0xff]  ;;  %533 = vst [vmem:[%s1161_s1 + $0x288] sm:$0xff] %v532_v11  ;;  %v540_v15 = vld [vmem:[%s1160_s0 + $0x2e8] sm:$0xff] }
  0x28   :  { %v536_v13 = vld [vmem:[%s1160_s0 + $0x2b8] sm:$0xff]  ;;  %535 = vst [vmem:[%s1161_s1 + $0x138] sm:$0xff] %v534_v12  ;;  %v542_v16 = vld [vmem:[%s1160_s0 + $0x8] sm:$0xff]  ;;  %539 = vst [vmem:[%s1161_s1 + $0x168] sm:$0xff] %v538_v14 }
  0x29   :  { %537 = vst [vmem:[%s1161_s1 + $0x2b8] sm:$0xff] %v536_v13  ;;  %541 = vst [vmem:[%s1161_s1 + $0x2e8] sm:$0xff] %v540_v15  ;;  %v544_v17 = vld [vmem:[%s1160_s0 + $0x188] sm:$0xff]  ;;  %v546_v18 = vld [vmem:[%s1160_s0 + $0x38] sm:$0xff] }
  0x2a   :  { %543 = vst [vmem:[%s1161_s1 + $0x28] sm:$0xff] %v542_v16  ;;  %v548_v19 = vld [vmem:[%s1160_s0 + $0x1b8] sm:$0xff]  ;;  %545 = vst [vmem:[%s1161_s1 + $0x1a8] sm:$0xff] %v544_v17  ;;  %v550_v20 = vld [vmem:[%s1160_s0 + $0x68] sm:$0xff] }
  0x2b   :  { %547 = vst [vmem:[%s1161_s1 + $0x58] sm:$0xff] %v546_v18  ;;  %549 = vst [vmem:[%s1161_s1 + $0x1d8] sm:$0xff] %v548_v19  ;;  %v552_v21 = vld [vmem:[%s1160_s0 + $0x1e8] sm:$0xff]  ;;  %v554_v22 = vld [vmem:[%s1160_s0 + $0x98] sm:$0xff] }
  0x2c   :  { %551 = vst [vmem:[%s1161_s1 + $0x88] sm:$0xff] %v550_v20  ;;  %553 = vst [vmem:[%s1161_s1 + $0x208] sm:$0xff] %v552_v21  ;;  %v556_v23 = vld [vmem:[%s1160_s0 + $0x218] sm:$0xff]  ;;  %v558_v24 = vld [vmem:[%s1160_s0 + $0xc8] sm:$0xff] }
  0x2d   :  { %555 = vst [vmem:[%s1161_s1 + $0xb8] sm:$0xff] %v554_v22  ;;  %v560_v25 = vld [vmem:[%s1160_s0 + $0x248] sm:$0xff]  ;;  %557 = vst [vmem:[%s1161_s1 + $0x238] sm:$0xff] %v556_v23  ;;  %v562_v26 = vld [vmem:[%s1160_s0 + $0xf8] sm:$0xff] }
  0x2e   :  { %559 = vst [vmem:[%s1161_s1 + $0xe8] sm:$0xff] %v558_v24  ;;  %561 = vst [vmem:[%s1161_s1 + $0x268] sm:$0xff] %v560_v25  ;;  %v564_v27 = vld [vmem:[%s1160_s0 + $0x278] sm:$0xff]  ;;  %v566_v28 = vld [vmem:[%s1160_s0 + $0x128] sm:$0xff] }
  0x2f   :  { %563 = vst [vmem:[%s1161_s1 + $0x118] sm:$0xff] %v562_v26  ;;  %565 = vst [vmem:[%s1161_s1 + $0x298] sm:$0xff] %v564_v27  ;;  %v568_v29 = vld [vmem:[%s1160_s0 + $0x2a8] sm:$0xff]  ;;  %v570_v30 = vld [vmem:[%s1160_s0 + $0x158] sm:$0xff] }
  0x30   :  { %567 = vst [vmem:[%s1161_s1 + $0x148] sm:$0xff] %v566_v28  ;;  %v572_v31 = vld [vmem:[%s1160_s0 + $0x2d8] sm:$0xff]  ;;  %569 = vst [vmem:[%s1161_s1 + $0x2c8] sm:$0xff] %v568_v29 }
  0x31   :  { %571 = vst [vmem:[%s1161_s1 + $0x178] sm:$0xff] %v570_v30  ;;  %573 = vst [vmem:[%s1161_s1 + $0x2f8] sm:$0xff] %v572_v31 }

// kernel: operator_block_3d_forward.6
= control target key start
LH: loop header
LB: loop body
LE: loop exit
PB: predicated region body
PF: predicated region fallthrough
CT: control target
= control target key end

     0   :  { %s436_s9 = smov 0   ;;  %s438_s10 = smov 0   ;;  %s509_s0 = inlined_call_operand.vmem [shape: f32[2,8,2048], index: 0, kind: input, shape index: {}]   ;;  %s510_s1 = inlined_call_operand.vmem [shape: f32[2,8,1], index: 1, kind: output, shape index: {0}]   ;;  %s511_s2 = inlined_call_operand.vmem [shape: f32[2,8,1], index: 2, kind: output, shape index: {1}]  }
   0x1   :  { %s440_s11 = smov 0  }
   0x2 LB: > { %s25_s12 = sadd.s32 1, %s414_s10  ;;  %p363_p0 = scmp.ge.s32.totalorder %s418_s11, 1  ;;  %s418_s11 = sphi %s440_s11, %s13_s11   ;;  %s414_s10 = sphi %s438_s10, %s513_s10   ;;  %s410_s9 = sphi %s436_s9, %s512_s9  }
   0x3   : > { %p27_p1 = scmp.ge.s32.totalorder %s25_s12, 2  ;;  %p134_p2 = scmp.lt.s32.totalorder %s418_s11, 3 }
   0x5   : > { %s515_s12 = smov (%p27_p1, %s25_s12), 0  ;;  %p135_p3 = pnand %p363_p0, %p134_p2 }
   0x6   : > { %p164_p4 = scmp.lt.s32.totalorder (!%p135_p3), %s410_s9, 1  ;;  %vm185_vm0 = vcmask (!%p135_p3), 7168   ;;  %v420_v3 = vmov (!%p135_p3), 0.0  }
   0x7   : > { %138 = sbr.rel (%p135_p3) target bundleno = 197 (0xc5), region = 24 }
   0xe   : > { %s517_s9 = smov (!%p164_p4, %s410_s9), 1 }
   0xf   : > { %s370_s13 = sshll.u32 %s517_s9, 7  ;;  %s366_s14 = sshll.u32 %s517_s9, 3 }
  0x10   : > { %s461_s17 = scalar_lea.vmem %s509_s0, %s370_s13  ;;  %s468_s20 = scalar_lea.vmem %s510_s1, %s366_s14 }
  0x11   : > { %v188_v0 = vld [vmem:[%s461_s17] sm:$0xff]  ;;  %v189_v1 = vld [vmem:[%s461_s17 + $0x8] sm:$0xff]  ;;  %v190_v2 = vld [vmem:[%s461_s17 + $0x10] sm:$0xff]  ;;  %186 = vst.msk [vmem:[%s468_s20] sm:$0xff] %vm185_vm0, %v420_v3  ;;  %s180_s23 = scalar_lea.vmem %s511_s2, %s366_s14 }
  0x12   : > { %v205_v4 = vadd.f32 %v189_v1, %v188_v0  ;;  %v226_v5 = vmul.f32 %v188_v0, %v188_v0  ;;  %v227_v6 = vmul.f32 %v189_v1, %v189_v1  ;;  %v191_v7 = vld [vmem:[%s461_s17 + $0x18] sm:$0xff]  ;;  %v228_v8 = vmul.f32 %v190_v2, %v190_v2  ;;  %v192_v10 = vld [vmem:[%s461_s17 + $0x20] sm:$0xff]  ;;  %v193_v14 = vld [vmem:[%s461_s17 + $0x28] sm:$0xff]  ;;  %187 = vst.msk [vmem:[%s180_s23] sm:$0xff] %vm185_vm0, %v420_v3 }
  0x13   : > { %v229_v11 = vmul.f32 %v191_v7, %v191_v7  ;;  %v230_v15 = vmul.f32 %v192_v10, %v192_v10  ;;  %v194_v18 = vld [vmem:[%s461_s17 + $0x30] sm:$0xff]  ;;  %v231_v19 = vmul.f32 %v193_v14, %v193_v14  ;;  %v195_v22 = vld [vmem:[%s461_s17 + $0x38] sm:$0xff]  ;;  %v196_v26 = vld [vmem:[%s461_s17 + $0x40] sm:$0xff] }
  0x14   : > { %v206_v9 = vadd.f32 %v205_v4, %v190_v2  ;;  %v242_v12 = vadd.f32 %v227_v6, %v226_v5  ;;  %v232_v23 = vmul.f32 %v194_v18, %v194_v18  ;;  %v233_v27 = vmul.f32 %v195_v22, %v195_v22  ;;  %v197_v30 = vld [vmem:[%s461_s17 + $0x48] sm:$0xff]  ;;  %v198_v34 = vld [vmem:[%s461_s17 + $0x50] sm:$0xff]  ;;  %v199_v38 = vld [vmem:[%s461_s17 + $0x58] sm:$0xff] }
  0x15   : > { %v234_v31 = vmul.f32 %v196_v26, %v196_v26  ;;  %v235_v35 = vmul.f32 %v197_v30, %v197_v30  ;;  %v236_v39 = vmul.f32 %v198_v34, %v198_v34  ;;  %v200_v42 = vld [vmem:[%s461_s17 + $0x60] sm:$0xff]  ;;  %v237_v43 = vmul.f32 %v199_v38, %v199_v38  ;;  %v201_v46 = vld [vmem:[%s461_s17 + $0x68] sm:$0xff]  ;;  %v202_v50 = vld [vmem:[%s461_s17 + $0x70] sm:$0xff] }
  0x16   : > { %v207_v13 = vadd.f32 %v206_v9, %v191_v7  ;;  %v243_v16 = vadd.f32 %v242_v12, %v228_v8  ;;  %v238_v47 = vmul.f32 %v200_v42, %v200_v42  ;;  %v239_v51 = vmul.f32 %v201_v46, %v201_v46  ;;  %v203_v54 = vld [vmem:[%s461_s17 + $0x78] sm:$0xff] }
  0x17   : > { %v240_v55 = vmul.f32 %v202_v50, %v202_v50  ;;  %v241_v58 = vmul.f32 %v203_v54, %v203_v54 }
  0x18   : > { %v208_v17 = vadd.f32 %v207_v13, %v192_v10  ;;  %v244_v20 = vadd.f32 %v243_v16, %v229_v11  ;;  %v204_v63 = vld [vmem:[%s468_s20] sm:$0xff] }
  0x19   : > { %v225_v2 = vld [vmem:[%s180_s23] sm:$0xff] }
  0x1a   : > { %v209_v21 = vadd.f32 %v208_v17, %v193_v14  ;;  %v245_v24 = vadd.f32 %v244_v20, %v230_v15 }
  0x1c   : > { %v210_v25 = vadd.f32 %v209_v21, %v194_v18  ;;  %v246_v28 = vadd.f32 %v245_v24, %v231_v19 }
  0x1e   : > { %v211_v29 = vadd.f32 %v210_v25, %v195_v22  ;;  %v247_v32 = vadd.f32 %v246_v28, %v232_v23 }
  0x20   : > { %v212_v33 = vadd.f32 %v211_v29, %v196_v26  ;;  %v248_v36 = vadd.f32 %v247_v32, %v233_v27 }
  0x22   : > { %v213_v37 = vadd.f32 %v212_v33, %v197_v30  ;;  %v249_v40 = vadd.f32 %v248_v36, %v234_v31 }
  0x24   : > { %v214_v41 = vadd.f32 %v213_v37, %v198_v34  ;;  %v250_v44 = vadd.f32 %v249_v40, %v235_v35 }
  0x26   : > { %v215_v45 = vadd.f32 %v214_v41, %v199_v38  ;;  %v251_v48 = vadd.f32 %v250_v44, %v236_v39 }
  0x28   : > { %v216_v49 = vadd.f32 %v215_v45, %v200_v42  ;;  %v252_v52 = vadd.f32 %v251_v48, %v237_v43 }
  0x2a   : > { %v217_v53 = vadd.f32 %v216_v49, %v201_v46  ;;  %v253_v56 = vadd.f32 %v252_v52, %v238_v47 }
  0x2c   : > { %v218_v57 = vadd.f32 %v217_v53, %v202_v50  ;;  %v254_v59 = vadd.f32 %v253_v56, %v239_v51 }
  0x2e   : > { %v219_v60 = vadd.f32 %v218_v57, %v203_v54  ;;  %v255_v61 = vadd.f32 %v254_v59, %v240_v55 }
  0x30   : > { %220 = vadd.xlane.f32.xlu0 %v219_v60  ;;  %v256_v62 = vadd.f32 %v255_v61, %v241_v58 }
  0x34   : > { %257 = vadd.xlane.f32.xlu0 %v256_v62 }
  0xbd   : > { %v221_v0 = vpop.xlane.xlu0 %220 }
  0xbe   : > { %v222_v1 = vadd.f32 %v221_v0, %v204_v63 }
  0xc0   : > { %224 = vst.msk [vmem:[%s468_s20] sm:$0xff] %vm185_vm0, %v222_v1 }
  0xc1   : > { %v258_v4 = vpop.xlane.xlu0 %257 }
  0xc2   : > { %v259_v5 = vadd.f32 %v258_v4, %v225_v2 }
  0xc4   : > { %260 = vst.msk [vmem:[%s180_s23] sm:$0xff] %vm185_vm0, %v259_v5 }
  0xc5 PF: > { %s13_s11 = sadd.s32 1, %s418_s11   ;;  %s512_s9 = smov %s414_s10 }
  0xc6   : > { %p10_p5 = scmp.ge.s32.totalorder %s13_s11, 4   ;;  %s513_s10 = smov %s515_s12 }
  0xc8   :  { %12 = sbr.rel (!%p10_p5) target bundleno = 2 (0x2), region = 70 }

// kernel: operator_block_3d_forward.7
= control target key start
LH: loop header
LB: loop body
LE: loop exit
PB: predicated region body
PF: predicated region fallthrough
CT: control target
= control target key end

     0   :  { %s726_s18 = smov 0   ;;  %s728_s19 = smov 0   ;;  %s911_s0 = inlined_call_operand.vmem [shape: f32[2,8,2048], index: 0, kind: input, shape index: {}]   ;;  %s912_s1 = inlined_call_operand.vmem [shape: f32[2,8,1], index: 1, kind: input, shape index: {}]   ;;  %s913_s2 = inlined_call_operand.vmem [shape: f32[2,8,1], index: 2, kind: input, shape index: {}]   ;;  %s914_s3 = inlined_call_operand.vmem [shape: f32[8,1], index: 3, kind: input, shape index: {}]   ;;  %s915_s4 = inlined_call_operand.vmem [shape: f32[8,1], index: 4, kind: input, shape index: {}]   ;;  %s916_s5 = inlined_call_operand.vmem [shape: f32[2,8,2048], index: 5, kind: output, shape index: {}]  }
   0x1   :  { %s730_s20 = smov 0  }
   0x2 LB: > { %s27_s21 = sadd.s32 1, %s689_s19  ;;  %p599_p0 = scmp.ge.s32.totalorder %s693_s20, 1  ;;  %s693_s20 = sphi %s730_s20, %s15_s20   ;;  %s689_s19 = sphi %s728_s19, %s918_s19   ;;  %s685_s18 = sphi %s726_s18, %s917_s18  }
   0x3   : > { %p29_p1 = scmp.ge.s32.totalorder %s27_s21, 2  ;;  %p226_p2 = scmp.lt.s32.totalorder %s693_s20, 3 }
   0x5   : > { %s920_s21 = smov (%p29_p1, %s27_s21), 0  ;;  %p227_p3 = pnand %p599_p0, %p226_p2 }
   0x6   : > { %p271_p4 = scmp.lt.s32.totalorder (!%p227_p3), %s685_s18, 1  ;;  %v366_v0 = vld [vmem:[%s915_s4] sm:$0xff] (!%p227_p3)  ;;  %v695_v1 = vmov (!%p227_p3), 0  }
   0x7   : > { %230 = sbr.rel (%p227_p3) target bundleno = 204 (0xcc), region = 40  ;;  %635 = vset.pattern.permute.xlu0 (!%p227_p3), %v695_v1  ;;  %636 = vset.pattern.permute.xlu1 (!%p227_p3), %v695_v1  ;;  %v306_v9 = vld [vmem:[%s914_s3] sm:$0xff] (!%p227_p3) }
   0x8   : > { %369 = vperm.xlu1 (!%p227_p3), %636, %v366_v0  }
   0xe   : > { %s922_s18 = smov (!%p271_p4, %s685_s18), 1 }
   0xf   : > { %s602_s24 = sshll.u32 %s922_s18, 3  ;;  %s608_s8 = sshll.u32 %s922_s18, 7 }
  0x10   : > { %s283_s27 = scalar_lea.vmem %s912_s1, %s602_s24  ;;  %s287_s30 = scalar_lea.vmem %s913_s2, %s602_s24 }
  0x11   : > { %v298_v2 = vld [vmem:[%s283_s27] sm:$0xff]  ;;  %s767_s11 = scalar_lea.vmem %s911_s0, %s608_s8  ;;  %s869_s14 = scalar_lea.vmem %s916_s5, %s608_s8 }
  0x12   : > { %v300_v3 = vld [vmem:[%s287_s30] sm:$0xff]  ;;  %v299_v4 = vmul.f32 0.00048828125, %v298_v2  ;;  %v309_v14 = vld [vmem:[%s767_s11 + $0x8] sm:$0xff]  ;;  %v310_v15 = vld [vmem:[%s767_s11 + $0x10] sm:$0xff] }
  0x13   : > { %v301_v5 = vmul.f32 0.00048828125, %v300_v3  ;;  %v308_v13 = vld [vmem:[%s767_s11] sm:$0xff]  ;;  %v311_v16 = vld [vmem:[%s767_s11 + $0x18] sm:$0xff]  ;;  %v313_v19 = vld [vmem:[%s767_s11 + $0x28] sm:$0xff] }
  0x14   : > { %326 = vperm.xlu0 %635, %v299_v4   ;;  %v302_v6 = vmul.f32 %v299_v4, %v299_v4  ;;  %v312_v18 = vld [vmem:[%s767_s11 + $0x20] sm:$0xff]  ;;  %v314_v23 = vld [vmem:[%s767_s11 + $0x30] sm:$0xff]  ;;  %v315_v25 = vld [vmem:[%s767_s11 + $0x38] sm:$0xff] }
  0x15   : > { %v316_v26 = vld [vmem:[%s767_s11 + $0x40] sm:$0xff]  ;;  %v317_v27 = vld [vmem:[%s767_s11 + $0x48] sm:$0xff]  ;;  %v318_v35 = vld [vmem:[%s767_s11 + $0x50] sm:$0xff] }
  0x16   : > { %v303_v7 = vsub.f32 %v301_v5, %v302_v6  ;;  %v319_v36 = vld [vmem:[%s767_s11 + $0x58] sm:$0xff]  ;;  %v320_v39 = vld [vmem:[%s767_s11 + $0x60] sm:$0xff]  ;;  %v321_v40 = vld [vmem:[%s767_s11 + $0x68] sm:$0xff] }
  0x17   : > { %v322_v45 = vld [vmem:[%s767_s11 + $0x70] sm:$0xff]  ;;  %v323_v54 = vld [vmem:[%s767_s11 + $0x78] sm:$0xff] }
  0x18   : > { %v304_v8 = vadd.f32 1e-05, %v303_v7 }
  0x1a   : > { %637 = vrsqrt.f32 %v304_v8 }
  0x24   : > { %v638_v10 = vpop.eup %637 }
  0x25   : > { %v307_v11 = vmul.f32 %v638_v10, %v306_v9 }
  0x27   : > { %347 = vperm.xlu0 %635, %v307_v11  }
  0x87   : > { %v370_v34 = vpop.permute.xlu1 %369 }
  0x93   : > { %v760_v12 = vpop.permute.xlu0 %326 }
  0x94   : > { %v329_v20 = vsub.f32 %v308_v13, %v760_v12  ;;  %v330_v21 = vsub.f32 %v309_v14, %v760_v12  ;;  %v331_v22 = vsub.f32 %v310_v15, %v760_v12  ;;  %v332_v24 = vsub.f32 %v311_v16, %v760_v12 }
  0x95   : > { %v333_v28 = vsub.f32 %v312_v18, %v760_v12  ;;  %v334_v32 = vsub.f32 %v313_v19, %v760_v12  ;;  %v335_v37 = vsub.f32 %v314_v23, %v760_v12  ;;  %v336_v41 = vsub.f32 %v315_v25, %v760_v12 }
  0x96   : > { %v337_v42 = vsub.f32 %v316_v26, %v760_v12  ;;  %v338_v43 = vsub.f32 %v317_v27, %v760_v12  ;;  %v339_v50 = vsub.f32 %v318_v35, %v760_v12  ;;  %v340_v51 = vsub.f32 %v319_v36, %v760_v12 }
  0x97   : > { %v341_v55 = vsub.f32 %v320_v39, %v760_v12  ;;  %v342_v56 = vsub.f32 %v321_v40, %v760_v12  ;;  %v343_v59 = vsub.f32 %v322_v45, %v760_v12  ;;  %v344_v3 = vsub.f32 %v323_v54, %v760_v12 }
  0xa6   : > { %v773_v17 = vpop.permute.xlu0 %347 }
  0xa7   : > { %v350_v29 = vmul.f32 %v773_v17, %v329_v20  ;;  %v351_v30 = vmul.f32 %v773_v17, %v330_v21  ;;  %v352_v31 = vmul.f32 %v773_v17, %v331_v22  ;;  %v353_v33 = vmul.f32 %v773_v17, %v332_v24 }
  0xa8   : > { %v354_v38 = vmul.f32 %v773_v17, %v333_v28  ;;  %v355_v44 = vmul.f32 %v773_v17, %v334_v32  ;;  %v356_v46 = vmul.f32 %v773_v17, %v335_v37  ;;  %v357_v52 = vmul.f32 %v773_v17, %v336_v41 }
  0xa9   : > { %v372_v47 = vadd.f32 %v370_v34, %v350_v29  ;;  %v803_v48 = vadd.f32 %v370_v34, %v351_v30  ;;  %v805_v49 = vadd.f32 %v370_v34, %v352_v31  ;;  %v810_v53 = vadd.f32 %v370_v34, %v353_v33 }
  0xaa   : > { %v358_v57 = vmul.f32 %v773_v17, %v337_v42  ;;  %v816_v58 = vadd.f32 %v370_v34, %v354_v38  ;;  %v359_v60 = vmul.f32 %v773_v17, %v338_v43  ;;  %v360_v61 = vmul.f32 %v773_v17, %v339_v50 }
  0xab   : > { %v821_v62 = vadd.f32 %v370_v34, %v355_v44  ;;  %v823_v63 = vadd.f32 %v370_v34, %v356_v46  ;;  %v404_v0 = vmul.f32 0.70710677, %v372_v47  ;;  %v405_v1 = vmul.f32 0.70710677, %v803_v48 }
  0xac   : > { %v406_v2 = vmul.f32 0.70710677, %v805_v49  ;;  %v361_v4 = vmul.f32 %v773_v17, %v340_v51  ;;  %v829_v5 = vadd.f32 %v370_v34, %v357_v52  ;;  %v407_v6 = vmul.f32 0.70710677, %v810_v53 }
  0xad   : > { %v362_v7 = vmul.f32 %v773_v17, %v341_v55  ;;  %v833_v8 = vadd.f32 %v370_v34, %v358_v57  ;;  %v408_v9 = vmul.f32 0.70710677, %v816_v58  ;;  %639 = verf.f32 %v404_v0 }
  0xae   : > { %v363_v10 = vmul.f32 %v773_v17, %v342_v56  ;;  %v837_v11 = vadd.f32 %v370_v34, %v359_v60  ;;  %v409_v13 = vmul.f32 0.70710677, %v821_v62  ;;  %641 = verf.f32 %v405_v1 }
  0xaf   : > { %v364_v12 = vmul.f32 %v773_v17, %v343_v59  ;;  %v841_v14 = vadd.f32 %v370_v34, %v360_v61  ;;  %v410_v15 = vmul.f32 0.70710677, %v823_v63  ;;  %643 = verf.f32 %v406_v2 }
  0xb0   : > { %v365_v16 = vmul.f32 %v773_v17, %v344_v3  ;;  %v845_v18 = vadd.f32 %v370_v34, %v361_v4  ;;  %v411_v19 = vmul.f32 0.70710677, %v829_v5  ;;  %645 = verf.f32 %v407_v6 }
  0xb1   : > { %v848_v20 = vadd.f32 %v370_v34, %v362_v7  ;;  %v412_v21 = vmul.f32 0.70710677, %v833_v8  ;;  %647 = verf.f32 %v408_v9  ;;  %v851_v22 = vadd.f32 %v370_v34, %v363_v10 }
  0xb2   : > { %v413_v23 = vmul.f32 0.70710677, %v837_v11  ;;  %649 = verf.f32 %v409_v13  ;;  %v854_v24 = vadd.f32 %v370_v34, %v364_v12  ;;  %v414_v25 = vmul.f32 0.70710677, %v841_v14 }
  0xb3   : > { %651 = verf.f32 %v410_v15  ;;  %v857_v17 = vadd.f32 %v370_v34, %v365_v16  ;;  %v415_v26 = vmul.f32 0.70710677, %v845_v18  ;;  %v416_v27 = vmul.f32 0.70710677, %v848_v20 }
  0xb4   : > { %653 = verf.f32 %v411_v19  ;;  %v417_v28 = vmul.f32 0.70710677, %v851_v22  ;;  %v418_v30 = vmul.f32 0.70710677, %v854_v24  ;;  %v388_v32 = vmul.f32 0.5, %v372_v47 }
  0xb5   : > { %655 = verf.f32 %v412_v21  ;;  %v419_v33 = vmul.f32 0.70710677, %v857_v17  ;;  %v389_v36 = vmul.f32 0.5, %v803_v48  ;;  %v390_v39 = vmul.f32 0.5, %v805_v49 }
  0xb6   : > { %657 = verf.f32 %v413_v23  ;;  %v391_v43 = vmul.f32 0.5, %v810_v53  ;;  %v392_v47 = vmul.f32 0.5, %v816_v58  ;;  %v393_v51 = vmul.f32 0.5, %v821_v62 }
  0xb7   : > { %v640_v29 = vpop.eup %639  ;;  %659 = verf.f32 %v414_v25  ;;  %v394_v55 = vmul.f32 0.5, %v823_v63  ;;  %v395_v59 = vmul.f32 0.5, %v829_v5  ;;  %v396_v62 = vmul.f32 0.5, %v833_v8 }
  0xb8   : > { %v642_v31 = vpop.eup %641  ;;  %661 = verf.f32 %v415_v26  ;;  %v436_v34 = vadd.f32 1.0, %v640_v29  ;;  %v397_v63 = vmul.f32 0.5, %v837_v11  ;;  %v398_v5 = vmul.f32 0.5, %v841_v14 }
  0xb9   : > { %v644_v35 = vpop.eup %643  ;;  %663 = verf.f32 %v416_v27  ;;  %v437_v37 = vadd.f32 1.0, %v642_v31  ;;  %v399_v8 = vmul.f32 0.5, %v845_v18  ;;  %v400_v11 = vmul.f32 0.5, %v848_v20 }
  0xba   : > { %v646_v38 = vpop.eup %645  ;;  %665 = verf.f32 %v417_v28  ;;  %v438_v40 = vadd.f32 1.0, %v644_v35  ;;  %v452_v41 = vmul.f32 %v436_v34, %v388_v32  ;;  %v401_v23 = vmul.f32 0.5, %v851_v22 }
  0xbb   : > { %v648_v42 = vpop.eup %647  ;;  %667 = verf.f32 %v418_v30  ;;  %v439_v44 = vadd.f32 1.0, %v646_v38  ;;  %v453_v45 = vmul.f32 %v437_v37, %v389_v36  ;;  %v402_v27 = vmul.f32 0.5, %v854_v24 }
  0xbc   : > { %v650_v46 = vpop.eup %649  ;;  %669 = verf.f32 %v419_v33  ;;  %v440_v48 = vadd.f32 1.0, %v648_v42  ;;  %v454_v50 = vmul.f32 %v438_v40, %v390_v39  ;;  %468 = vst [vmem:[%s869_s14] sm:$0xff] %v452_v41  ;;  %v403_v20 = vmul.f32 0.5, %v857_v17 }
  0xbd   : > { %v652_v49 = vpop.eup %651  ;;  %v441_v52 = vadd.f32 1.0, %v650_v46  ;;  %v455_v54 = vmul.f32 %v439_v44, %v391_v43  ;;  %469 = vst [vmem:[%s869_s14 + $0x8] sm:$0xff] %v453_v45 }
  0xbe   : > { %v654_v53 = vpop.eup %653  ;;  %v442_v56 = vadd.f32 1.0, %v652_v49  ;;  %v456_v57 = vmul.f32 %v440_v48, %v392_v47  ;;  %470 = vst [vmem:[%s869_s14 + $0x10] sm:$0xff] %v454_v50 }
  0xbf   : > { %v656_v58 = vpop.eup %655  ;;  %v443_v60 = vadd.f32 1.0, %v654_v53  ;;  %v457_v61 = vmul.f32 %v441_v52, %v393_v51  ;;  %471 = vst [vmem:[%s869_s14 + $0x18] sm:$0xff] %v455_v54 }
  0xc0   : > { %v658_v0 = vpop.eup %657  ;;  %v444_v1 = vadd.f32 1.0, %v656_v58  ;;  %v458_v2 = vmul.f32 %v442_v56, %v394_v55  ;;  %472 = vst [vmem:[%s869_s14 + $0x20] sm:$0xff] %v456_v57 }
  0xc1   : > { %v660_v3 = vpop.eup %659  ;;  %v445_v4 = vadd.f32 1.0, %v658_v0  ;;  %v459_v6 = vmul.f32 %v443_v60, %v395_v59  ;;  %473 = vst [vmem:[%s869_s14 + $0x28] sm:$0xff] %v457_v61 }
  0xc2   : > { %v662_v7 = vpop.eup %661  ;;  %v446_v9 = vadd.f32 1.0, %v660_v3  ;;  %v460_v10 = vmul.f32 %v444_v1, %v396_v62  ;;  %474 = vst [vmem:[%s869_s14 + $0x30] sm:$0xff] %v458_v2 }
  0xc3   : > { %v664_v13 = vpop.eup %663  ;;  %v447_v12 = vadd.f32 1.0, %v662_v7  ;;  %v461_v15 = vmul.f32 %v445_v4, %v397_v63  ;;  %475 = vst [vmem:[%s869_s14 + $0x38] sm:$0xff] %v459_v6 }
  0xc4   : > { %v666_v16 = vpop.eup %665  ;;  %v448_v19 = vadd.f32 1.0, %v664_v13  ;;  %v462_v21 = vmul.f32 %v446_v9, %v398_v5  ;;  %476 = vst [vmem:[%s869_s14 + $0x40] sm:$0xff] %v460_v10 }
  0xc5   : > { %v668_v14 = vpop.eup %667  ;;  %v449_v25 = vadd.f32 1.0, %v666_v16  ;;  %v463_v26 = vmul.f32 %v447_v12, %v399_v8  ;;  %477 = vst [vmem:[%s869_s14 + $0x48] sm:$0xff] %v461_v15 }
  0xc6   : > { %v670_v18 = vpop.eup %669  ;;  %v450_v28 = vadd.f32 1.0, %v668_v14  ;;  %v464_v29 = vmul.f32 %v448_v19, %v400_v11  ;;  %478 = vst [vmem:[%s869_s14 + $0x50] sm:$0xff] %v462_v21 }
  0xc7   : > { %v451_v30 = vadd.f32 1.0, %v670_v18  ;;  %v465_v31 = vmul.f32 %v449_v25, %v401_v23  ;;  %479 = vst [vmem:[%s869_s14 + $0x58] sm:$0xff] %v463_v26 }
  0xc8   : > { %v466_v32 = vmul.f32 %v450_v28, %v402_v27  ;;  %480 = vst [vmem:[%s869_s14 + $0x60] sm:$0xff] %v464_v29 }
  0xc9   : > { %v467_v22 = vmul.f32 %v451_v30, %v403_v20  ;;  %481 = vst [vmem:[%s869_s14 + $0x68] sm:$0xff] %v465_v31 }
  0xca   : > { %482 = vst [vmem:[%s869_s14 + $0x70] sm:$0xff] %v466_v32 }
  0xcb   : > { %483 = vst [vmem:[%s869_s14 + $0x78] sm:$0xff] %v467_v22 }
  0xcc PF: > { %s15_s20 = sadd.s32 1, %s693_s20   ;;  %s917_s18 = smov %s689_s19 }
  0xcd   : > { %p12_p5 = scmp.ge.s32.totalorder %s15_s20, 4   ;;  %s918_s19 = smov %s920_s21 }
  0xcf   :  { %14 = sbr.rel (!%p12_p5) target bundleno = 2 (0x2), region = 76 }

</bundles_post_ra>
